<compile_context>
chip_gen: v5e
topology: v5e:2x2
jax: 0.10.0
libtpu: 0.0.40
codegen_flags: <defaults>
</compile_context>

<pallas_src>
import functools

import jax
import jax.numpy as jnp
import numpy as np
from jax.experimental import pallas as pl
from jax.experimental.pallas import tpu as pltpu


# ------------------------------ Pallas kernel ------------------------------ #

def fused_lstm_fc_kernel(*refs, n_layers, T, B_pad, H):
    """Fused multi-layer LSTM + Linear(hidden -> 1).

    refs layout:
      [ x_ref,                                   # (T*B_pad, D_in) time-major rows
        (wih_t, whh_t, bias) * n_layers,         # (D,4H), (H,4H), (1,4H)
        h0_ref, c0_ref,                          # (n_layers, B_pad, H)
        fcw_ref, fcb_ref,                        # (H,1), (1,1)
        out_ref,                                 # (B_pad, T)
        gx_sc,                                   # VMEM scratch (T*B_pad, 4H)
        hseq_sc ]                                # VMEM scratch (T*B_pad, H)
    """
    x_ref = refs[0]
    layer_refs = refs[1:1 + 3 * n_layers]
    h0_ref, c0_ref, fcw_ref, fcb_ref = refs[1 + 3 * n_layers:5 + 3 * n_layers]
    out_ref = refs[5 + 3 * n_layers]
    gx_sc = refs[6 + 3 * n_layers]      # (T*B_pad, 4H) hoisted input projections
    hseq_sc = refs[7 + 3 * n_layers]    # (T*B_pad, H)  inter-layer hidden states

    fcw = fcw_ref[...]                  # (H, 1)
    fcb = fcb_ref[...]                  # (1, 1)

    for layer in range(n_layers):
        wih = layer_refs[3 * layer][...]               # (D_in or H, 4H)
        whh = layer_refs[3 * layer + 1][...]           # (H, 4H)
        bias = layer_refs[3 * layer + 2][...]          # (1, 4H)
        is_last = (layer == n_layers - 1)

        # Hoisted non-recurrent projection + bias: one big matmul for all T
        # steps, staged in VMEM so the unrolled time loop only keeps one
        # (B_pad, 4H) tile live per iteration.
        seq = x_ref[...] if layer == 0 else hseq_sc[...]
        gx_sc[...] = jnp.dot(seq, wih,
                             preferred_element_type=jnp.float32) + bias

        h = h0_ref[layer]                              # (B_pad, H)
        c = c0_ref[layer]                              # (B_pad, H)

        # Small fixed T: fully unrolled; (h, c) stay in vregs.
        # TODO(synk): switch to lax.fori_loop(unroll=2..4) + pl.ds if T grows.
        for t in range(T):
            r0 = t * B_pad                             # static, multiple of 8
            gates = gx_sc[r0:r0 + B_pad, :] + jnp.dot(
                h, whh, preferred_element_type=jnp.float32)        # (B_pad, 4H)

            # Whole-vreg nonlinearities (3 EUP issues), then cheap lane slices.
            sig_all = jax.nn.sigmoid(gates)
            tanh_all = jnp.tanh(gates)
            i_g = sig_all[:, 0 * H:1 * H]
            f_g = sig_all[:, 1 * H:2 * H]
            g_g = tanh_all[:, 2 * H:3 * H]
            o_g = sig_all[:, 3 * H:4 * H]

            c = f_g * c + i_g * g_g
            h = o_g * jnp.tanh(c)

            if is_last:
                # Final Linear fused into the recurrence; tiny per-step matmul
                # overlaps with the serial chain. One column of the (B_pad, T)
                # output per step; last layer never touches the hseq slab.
                out_ref[:, t:t + 1] = (jnp.dot(
                    h, fcw, preferred_element_type=jnp.float32) + fcb)
            else:
                hseq_sc[r0:r0 + B_pad, :] = h          # aligned, unmasked store

        # TODO(synk): training-mode inter-layer dropout (p=0.5) not implemented
        # (inference identity, matching eval()).


# ------------------------------ JAX wrapper -------------------------------- #

def _round_up(x, m):
    return (x + m - 1) // m * m


@jax.jit
def lstm_net_forward(x, params, h0, c0):
    """
    x:  (B, T, D_in)  batch-first, like PyTorch nn.LSTM(batch_first=True).
    h0, c0: (n_layers, B, H)
    Returns (B, T) — matching `out.squeeze()` for output_size == 1 (B > 1).
    """
    x = x.astype(jnp.float32)
    B, T, D = x.shape
    n_layers, _, H = h0.shape

    # Pad batch to the 8-row sublane width: all per-step slices become aligned
    # and unmasked; padded rows are zero and sliced away on return.
    B_pad = _round_up(B, 8)
    x_p = jnp.zeros((B_pad, T, D), jnp.float32).at[:B].set(x)
    h0_p = jnp.zeros((n_layers, B_pad, H), jnp.float32).at[:, :B].set(
        h0.astype(jnp.float32))
    c0_p = jnp.zeros((n_layers, B_pad, H), jnp.float32).at[:, :B].set(
        c0.astype(jnp.float32))

    # Time-major, flattened rows: row index = t * B_pad + b.
    x_tm = jnp.transpose(x_p, (1, 0, 2)).reshape(T * B_pad, D)

    inputs = [x_tm]
    for layer in range(n_layers):
        p = params["lstm"][layer]
        inputs += [p["wih_t"], p["whh_t"], p["bias"]]
    inputs += [h0_p, c0_p, params["fc"]["w_t"], params["fc"]["b"]]

    kernel = functools.partial(fused_lstm_fc_kernel,
                               n_layers=n_layers, T=T, B_pad=B_pad, H=H)
    out = pl.pallas_call(
        kernel,
        out_shape=jax.ShapeDtypeStruct((B_pad, T), jnp.float32),
        scratch_shapes=[pltpu.VMEM((T * B_pad, 4 * H), jnp.float32),
                        pltpu.VMEM((T * B_pad, H), jnp.float32)],
        compiler_params=pltpu.CompilerParams(
            vmem_limit_bytes=32 * 1024 * 1024),
    )(*inputs)                                         # (B_pad, T)

    return out[:B, :]                                  # drop batch padding


# --------------------------- Parameter construction ------------------------ #

def init_params(key, input_dim, hidden_dim, n_layers):
    """Deterministic init mimicking PyTorch shapes (uniform(-1/sqrt(H), 1/sqrt(H)))."""
    H = hidden_dim
    bound = 1.0 / np.sqrt(H)
    lstm_params = []
    for layer in range(n_layers):
        d_in = input_dim if layer == 0 else H
        key, k1, k2, k3, k4 = jax.random.split(key, 5)
        w_ih = jax.random.uniform(k1, (4 * H, d_in), jnp.float32, -bound, bound)
        w_hh = jax.random.uniform(k2, (4 * H, H), jnp.float32, -bound, bound)
        b_ih = jax.random.uniform(k3, (4 * H,), jnp.float32, -bound, bound)
        b_hh = jax.random.uniform(k4, (4 * H,), jnp.float32, -bound, bound)
        lstm_params.append({
            "wih_t": w_ih.T,                              # (d_in, 4H)
            "whh_t": w_hh.T,                              # (H, 4H)
            "bias": (b_ih + b_hh).reshape(1, 4 * H),      # (1, 4H)
        })
    key, k1, k2 = jax.random.split(key, 3)
    fc_w = jax.random.uniform(k1, (1, H), jnp.float32, -bound, bound)
    fc_b = jax.random.uniform(k2, (1,), jnp.float32, -bound, bound)
    return {"lstm": lstm_params,
            "fc": {"w_t": fc_w.T, "b": fc_b.reshape(1, 1)}}


# ----------------------------- Pure-JAX reference --------------------------- #

def reference_forward(x, params, h0, c0):
    x = x.astype(jnp.float32)
    B, T, _ = x.shape
    h_seq = x
    n_layers = h0.shape[0]
    for layer in range(n_layers):
        p = params["lstm"][layer]
        H = p["whh_t"].shape[0]
        h = h0[layer]
        c = c0[layer]
        outs = []
        for t in range(T):
            gates = h_seq[:, t, :] @ p["wih_t"] + h @ p["whh_t"] + p["bias"]
            i_g = jax.nn.sigmoid(gates[:, 0 * H:1 * H])
            f_g = jax.nn.sigmoid(gates[:, 1 * H:2 * H])
            g_g = jnp.tanh(gates[:, 2 * H:3 * H])
            o_g = jax.nn.sigmoid(gates[:, 3 * H:4 * H])
            c = f_g * c + i_g * g_g
            h = o_g * jnp.tanh(c)
            outs.append(h)
        h_seq = jnp.stack(outs, axis=1)                    # (B, T, H)
    out = h_seq @ params["fc"]["w_t"] + params["fc"]["b"]  # (B, T, 1)
    return out[..., 0]


# ---------------------------------- Driver ---------------------------------- #

if __name__ == "__main__":
    input_dim, hidden_dim, n_layers, batch_size, seq_len = 4, 32, 2, 2, 8

    key = jax.random.PRNGKey(0)
    k_x, k_h, k_c, k_p = jax.random.split(key, 4)

    x = jax.random.normal(k_x, (batch_size, seq_len, input_dim), jnp.float32)
    h0 = jax.random.normal(k_h, (n_layers, batch_size, hidden_dim), jnp.float32)
    c0 = jax.random.normal(k_c, (n_layers, batch_size, hidden_dim), jnp.float32)
    params = init_params(k_p, input_dim, hidden_dim, n_layers)

    out = lstm_net_forward(x, params, h0, c0)
    out = jax.block_until_ready(out)

    ref = reference_forward(x, params, h0, c0)
    np.testing.assert_allclose(np.asarray(out), np.asarray(ref),
                               rtol=1e-4, atol=1e-4)
    assert out.shape == (batch_size, seq_len)

    print("KERNEL_OK")
</pallas_src>

<mosaic_0001>
module attributes {stable_mosaic.version = 11 : i64} {
  func.func @fused_lstm_fc_kernel(%arg0: memref<64x4xf32, #tpu.memory_space<vmem>>, %arg1: memref<4x128xf32, #tpu.memory_space<vmem>>, %arg2: memref<32x128xf32, #tpu.memory_space<vmem>>, %arg3: memref<1x128xf32, #tpu.memory_space<vmem>>, %arg4: memref<32x128xf32, #tpu.memory_space<vmem>>, %arg5: memref<32x128xf32, #tpu.memory_space<vmem>>, %arg6: memref<1x128xf32, #tpu.memory_space<vmem>>, %arg7: memref<2x8x32xf32, #tpu.memory_space<vmem>>, %arg8: memref<2x8x32xf32, #tpu.memory_space<vmem>>, %arg9: memref<32x1xf32, #tpu.memory_space<vmem>>, %arg10: memref<1x1xf32, #tpu.memory_space<vmem>>, %arg11: memref<8x8xf32, #tpu.memory_space<vmem>>, %arg12: memref<64x128xf32, #tpu.memory_space<vmem>>, %arg13: memref<64x32xf32, #tpu.memory_space<vmem>>) attributes {dimension_semantics = [], scalar_prefetch = 0 : i64, scratch_operands = 2 : i64, tpu.core_type = #tpu.core_type<tc>} {
    %c0 = arith.constant 0 : index
    %c0_0 = arith.constant 0 : index
    %0 = vector.load %arg9[%c0, %c0_0] : memref<32x1xf32, #tpu.memory_space<vmem>>, vector<32x1xf32>
    %c0_1 = arith.constant 0 : index
    %c0_2 = arith.constant 0 : index
    %1 = vector.load %arg10[%c0_1, %c0_2] : memref<1x1xf32, #tpu.memory_space<vmem>>, vector<1x1xf32>
    %c0_3 = arith.constant 0 : index
    %c0_4 = arith.constant 0 : index
    %2 = vector.load %arg1[%c0_3, %c0_4] : memref<4x128xf32, #tpu.memory_space<vmem>>, vector<4x128xf32>
    %c0_5 = arith.constant 0 : index
    %c0_6 = arith.constant 0 : index
    %3 = vector.load %arg2[%c0_5, %c0_6] : memref<32x128xf32, #tpu.memory_space<vmem>>, vector<32x128xf32>
    %c0_7 = arith.constant 0 : index
    %c0_8 = arith.constant 0 : index
    %4 = vector.load %arg3[%c0_7, %c0_8] : memref<1x128xf32, #tpu.memory_space<vmem>>, vector<1x128xf32>
    %c0_9 = arith.constant 0 : index
    %c0_10 = arith.constant 0 : index
    %5 = vector.load %arg0[%c0_9, %c0_10] : memref<64x4xf32, #tpu.memory_space<vmem>>, vector<64x4xf32>
    %cst = arith.constant dense<0.000000e+00> : vector<64x128xf32>
    %6 = tpu.matmul %5, %2, %cst {dimension_numbers = #tpu.dot_dimension_numbers<[1], [0], [0], [1], [0, 0, 1, 1], [], []>} : vector<64x4xf32>, vector<4x128xf32>, vector<64x128xf32> -> vector<64x128xf32>
    %7 = vector.broadcast %4 : vector<1x128xf32> to vector<64x128xf32>
    %8 = arith.addf %6, %7 : vector<64x128xf32>
    %c0_11 = arith.constant 0 : index
    %c0_12 = arith.constant 0 : index
    %9 = vector.load %arg12[%c0_11, %c0_12] : memref<64x128xf32, #tpu.memory_space<vmem>>, vector<64x128xf32>
    tpu.vector_store %arg12[%c0_11, %c0_12], %8 {strides = array<i32>} : memref<64x128xf32, #tpu.memory_space<vmem>>, vector<64x128xf32>,
    %c0_13 = arith.constant 0 : index
    %c0_14 = arith.constant 0 : index
    %c0_15 = arith.constant 0 : index
    %10 = vector.load %arg7[%c0_13, %c0_14, %c0_15] : memref<2x8x32xf32, #tpu.memory_space<vmem>>, vector<1x8x32xf32>
    %11 = vector.shape_cast %10 : vector<1x8x32xf32> to vector<8x32xf32>
    %c0_16 = arith.constant 0 : index
    %c0_17 = arith.constant 0 : index
    %c0_18 = arith.constant 0 : index
    %12 = vector.load %arg8[%c0_16, %c0_17, %c0_18] : memref<2x8x32xf32, #tpu.memory_space<vmem>>, vector<1x8x32xf32>
    %13 = vector.shape_cast %12 : vector<1x8x32xf32> to vector<8x32xf32>
    %c0_19 = arith.constant 0 : index
    %c0_20 = arith.constant 0 : index
    %14 = vector.load %arg12[%c0_19, %c0_20] : memref<64x128xf32, #tpu.memory_space<vmem>>, vector<8x128xf32>
    %cst_21 = arith.constant dense<0.000000e+00> : vector<8x128xf32>
    %15 = tpu.matmul %11, %3, %cst_21 {dimension_numbers = #tpu.dot_dimension_numbers<[1], [0], [0], [1], [0, 0, 1, 1], [], []>} : vector<8x32xf32>, vector<32x128xf32>, vector<8x128xf32> -> vector<8x128xf32>
    %16 = arith.addf %14, %15 : vector<8x128xf32>
    %17 = arith.negf %16 : vector<8x128xf32>
    %18 = math.exp %17 : vector<8x128xf32>
    %cst_22 = arith.constant 1.000000e+00 : f32
    %19 = vector.broadcast %cst_22 : f32 to vector<8x128xf32>
    %20 = arith.addf %19, %18 : vector<8x128xf32>
    %21 = arith.divf %19, %20 : vector<8x128xf32>
    %22 = math.tanh %16 : vector<8x128xf32>
    %23 = vector.extract_strided_slice %21 {offsets = [0, 0], sizes = [8, 32], strides = [1, 1]} : vector<8x128xf32> to vector<8x32xf32>
    %24 = vector.extract_strided_slice %21 {offsets = [0, 32], sizes = [8, 32], strides = [1, 1]} : vector<8x128xf32> to vector<8x32xf32>
    %25 = vector.extract_strided_slice %22 {offsets = [0, 64], sizes = [8, 32], strides = [1, 1]} : vector<8x128xf32> to vector<8x32xf32>
    %26 = vector.extract_strided_slice %21 {offsets = [0, 96], sizes = [8, 32], strides = [1, 1]} : vector<8x128xf32> to vector<8x32xf32>
    %27 = arith.mulf %24, %13 : vector<8x32xf32>
    %28 = arith.mulf %23, %25 : vector<8x32xf32>
    %29 = arith.addf %27, %28 : vector<8x32xf32>
    %30 = math.tanh %29 : vector<8x32xf32>
    %31 = arith.mulf %26, %30 : vector<8x32xf32>
    %c0_23 = arith.constant 0 : index
    %c0_24 = arith.constant 0 : index
    %32 = vector.load %arg13[%c0_23, %c0_24] : memref<64x32xf32, #tpu.memory_space<vmem>>, vector<8x32xf32>
    tpu.vector_store %arg13[%c0_23, %c0_24], %31 {strides = array<i32>} : memref<64x32xf32, #tpu.memory_space<vmem>>, vector<8x32xf32>,
    %c8 = arith.constant 8 : index
    %c0_25 = arith.constant 0 : index
    %33 = vector.load %arg12[%c8, %c0_25] : memref<64x128xf32, #tpu.memory_space<vmem>>, vector<8x128xf32>
    %cst_26 = arith.constant dense<0.000000e+00> : vector<8x128xf32>
    %34 = tpu.matmul %31, %3, %cst_26 {dimension_numbers = #tpu.dot_dimension_numbers<[1], [0], [0], [1], [0, 0, 1, 1], [], []>} : vector<8x32xf32>, vector<32x128xf32>, vector<8x128xf32> -> vector<8x128xf32>
    %35 = arith.addf %33, %34 : vector<8x128xf32>
    %36 = arith.negf %35 : vector<8x128xf32>
    %37 = math.exp %36 : vector<8x128xf32>
    %cst_27 = arith.constant 1.000000e+00 : f32
    %38 = vector.broadcast %cst_27 : f32 to vector<8x128xf32>
    %39 = arith.addf %38, %37 : vector<8x128xf32>
    %40 = arith.divf %38, %39 : vector<8x128xf32>
    %41 = math.tanh %35 : vector<8x128xf32>
    %42 = vector.extract_strided_slice %40 {offsets = [0, 0], sizes = [8, 32], strides = [1, 1]} : vector<8x128xf32> to vector<8x32xf32>
    %43 = vector.extract_strided_slice %40 {offsets = [0, 32], sizes = [8, 32], strides = [1, 1]} : vector<8x128xf32> to vector<8x32xf32>
    %44 = vector.extract_strided_slice %41 {offsets = [0, 64], sizes = [8, 32], strides = [1, 1]} : vector<8x128xf32> to vector<8x32xf32>
    %45 = vector.extract_strided_slice %40 {offsets = [0, 96], sizes = [8, 32], strides = [1, 1]} : vector<8x128xf32> to vector<8x32xf32>
    %46 = arith.mulf %43, %29 : vector<8x32xf32>
    %47 = arith.mulf %42, %44 : vector<8x32xf32>
    %48 = arith.addf %46, %47 : vector<8x32xf32>
    %49 = math.tanh %48 : vector<8x32xf32>
    %50 = arith.mulf %45, %49 : vector<8x32xf32>
    %c8_28 = arith.constant 8 : index
    %c0_29 = arith.constant 0 : index
    %51 = vector.load %arg13[%c8_28, %c0_29] : memref<64x32xf32, #tpu.memory_space<vmem>>, vector<8x32xf32>
    tpu.vector_store %arg13[%c8_28, %c0_29], %50 {strides = array<i32>} : memref<64x32xf32, #tpu.memory_space<vmem>>, vector<8x32xf32>,
    %c16 = arith.constant 16 : index
    %c0_30 = arith.constant 0 : index
    %52 = vector.load %arg12[%c16, %c0_30] : memref<64x128xf32, #tpu.memory_space<vmem>>, vector<8x128xf32>
    %cst_31 = arith.constant dense<0.000000e+00> : vector<8x128xf32>
    %53 = tpu.matmul %50, %3, %cst_31 {dimension_numbers = #tpu.dot_dimension_numbers<[1], [0], [0], [1], [0, 0, 1, 1], [], []>} : vector<8x32xf32>, vector<32x128xf32>, vector<8x128xf32> -> vector<8x128xf32>
    %54 = arith.addf %52, %53 : vector<8x128xf32>
    %55 = arith.negf %54 : vector<8x128xf32>
    %56 = math.exp %55 : vector<8x128xf32>
    %cst_32 = arith.constant 1.000000e+00 : f32
    %57 = vector.broadcast %cst_32 : f32 to vector<8x128xf32>
    %58 = arith.addf %57, %56 : vector<8x128xf32>
    %59 = arith.divf %57, %58 : vector<8x128xf32>
    %60 = math.tanh %54 : vector<8x128xf32>
    %61 = vector.extract_strided_slice %59 {offsets = [0, 0], sizes = [8, 32], strides = [1, 1]} : vector<8x128xf32> to vector<8x32xf32>
    %62 = vector.extract_strided_slice %59 {offsets = [0, 32], sizes = [8, 32], strides = [1, 1]} : vector<8x128xf32> to vector<8x32xf32>
    %63 = vector.extract_strided_slice %60 {offsets = [0, 64], sizes = [8, 32], strides = [1, 1]} : vector<8x128xf32> to vector<8x32xf32>
    %64 = vector.extract_strided_slice %59 {offsets = [0, 96], sizes = [8, 32], strides = [1, 1]} : vector<8x128xf32> to vector<8x32xf32>
    %65 = arith.mulf %62, %48 : vector<8x32xf32>
    %66 = arith.mulf %61, %63 : vector<8x32xf32>
    %67 = arith.addf %65, %66 : vector<8x32xf32>
    %68 = math.tanh %67 : vector<8x32xf32>
    %69 = arith.mulf %64, %68 : vector<8x32xf32>
    %c16_33 = arith.constant 16 : index
    %c0_34 = arith.constant 0 : index
    %70 = vector.load %arg13[%c16_33, %c0_34] : memref<64x32xf32, #tpu.memory_space<vmem>>, vector<8x32xf32>
    tpu.vector_store %arg13[%c16_33, %c0_34], %69 {strides = array<i32>} : memref<64x32xf32, #tpu.memory_space<vmem>>, vector<8x32xf32>,
    %c24 = arith.constant 24 : index
    %c0_35 = arith.constant 0 : index
    %71 = vector.load %arg12[%c24, %c0_35] : memref<64x128xf32, #tpu.memory_space<vmem>>, vector<8x128xf32>
    %cst_36 = arith.constant dense<0.000000e+00> : vector<8x128xf32>
    %72 = tpu.matmul %69, %3, %cst_36 {dimension_numbers = #tpu.dot_dimension_numbers<[1], [0], [0], [1], [0, 0, 1, 1], [], []>} : vector<8x32xf32>, vector<32x128xf32>, vector<8x128xf32> -> vector<8x128xf32>
    %73 = arith.addf %71, %72 : vector<8x128xf32>
    %74 = arith.negf %73 : vector<8x128xf32>
    %75 = math.exp %74 : vector<8x128xf32>
    %cst_37 = arith.constant 1.000000e+00 : f32
    %76 = vector.broadcast %cst_37 : f32 to vector<8x128xf32>
    %77 = arith.addf %76, %75 : vector<8x128xf32>
    %78 = arith.divf %76, %77 : vector<8x128xf32>
    %79 = math.tanh %73 : vector<8x128xf32>
    %80 = vector.extract_strided_slice %78 {offsets = [0, 0], sizes = [8, 32], strides = [1, 1]} : vector<8x128xf32> to vector<8x32xf32>
    %81 = vector.extract_strided_slice %78 {offsets = [0, 32], sizes = [8, 32], strides = [1, 1]} : vector<8x128xf32> to vector<8x32xf32>
    %82 = vector.extract_strided_slice %79 {offsets = [0, 64], sizes = [8, 32], strides = [1, 1]} : vector<8x128xf32> to vector<8x32xf32>
    %83 = vector.extract_strided_slice %78 {offsets = [0, 96], sizes = [8, 32], strides = [1, 1]} : vector<8x128xf32> to vector<8x32xf32>
    %84 = arith.mulf %81, %67 : vector<8x32xf32>
    %85 = arith.mulf %80, %82 : vector<8x32xf32>
    %86 = arith.addf %84, %85 : vector<8x32xf32>
    %87 = math.tanh %86 : vector<8x32xf32>
    %88 = arith.mulf %83, %87 : vector<8x32xf32>
    %c24_38 = arith.constant 24 : index
    %c0_39 = arith.constant 0 : index
    %89 = vector.load %arg13[%c24_38, %c0_39] : memref<64x32xf32, #tpu.memory_space<vmem>>, vector<8x32xf32>
    tpu.vector_store %arg13[%c24_38, %c0_39], %88 {strides = array<i32>} : memref<64x32xf32, #tpu.memory_space<vmem>>, vector<8x32xf32>,
    %c32 = arith.constant 32 : index
    %c0_40 = arith.constant 0 : index
    %90 = vector.load %arg12[%c32, %c0_40] : memref<64x128xf32, #tpu.memory_space<vmem>>, vector<8x128xf32>
    %cst_41 = arith.constant dense<0.000000e+00> : vector<8x128xf32>
    %91 = tpu.matmul %88, %3, %cst_41 {dimension_numbers = #tpu.dot_dimension_numbers<[1], [0], [0], [1], [0, 0, 1, 1], [], []>} : vector<8x32xf32>, vector<32x128xf32>, vector<8x128xf32> -> vector<8x128xf32>
    %92 = arith.addf %90, %91 : vector<8x128xf32>
    %93 = arith.negf %92 : vector<8x128xf32>
    %94 = math.exp %93 : vector<8x128xf32>
    %cst_42 = arith.constant 1.000000e+00 : f32
    %95 = vector.broadcast %cst_42 : f32 to vector<8x128xf32>
    %96 = arith.addf %95, %94 : vector<8x128xf32>
    %97 = arith.divf %95, %96 : vector<8x128xf32>
    %98 = math.tanh %92 : vector<8x128xf32>
    %99 = vector.extract_strided_slice %97 {offsets = [0, 0], sizes = [8, 32], strides = [1, 1]} : vector<8x128xf32> to vector<8x32xf32>
    %100 = vector.extract_strided_slice %97 {offsets = [0, 32], sizes = [8, 32], strides = [1, 1]} : vector<8x128xf32> to vector<8x32xf32>
    %101 = vector.extract_strided_slice %98 {offsets = [0, 64], sizes = [8, 32], strides = [1, 1]} : vector<8x128xf32> to vector<8x32xf32>
    %102 = vector.extract_strided_slice %97 {offsets = [0, 96], sizes = [8, 32], strides = [1, 1]} : vector<8x128xf32> to vector<8x32xf32>
    %103 = arith.mulf %100, %86 : vector<8x32xf32>
    %104 = arith.mulf %99, %101 : vector<8x32xf32>
    %105 = arith.addf %103, %104 : vector<8x32xf32>
    %106 = math.tanh %105 : vector<8x32xf32>
    %107 = arith.mulf %102, %106 : vector<8x32xf32>
    %c32_43 = arith.constant 32 : index
    %c0_44 = arith.constant 0 : index
    %108 = vector.load %arg13[%c32_43, %c0_44] : memref<64x32xf32, #tpu.memory_space<vmem>>, vector<8x32xf32>
    tpu.vector_store %arg13[%c32_43, %c0_44], %107 {strides = array<i32>} : memref<64x32xf32, #tpu.memory_space<vmem>>, vector<8x32xf32>,
    %c40 = arith.constant 40 : index
    %c0_45 = arith.constant 0 : index
    %109 = vector.load %arg12[%c40, %c0_45] : memref<64x128xf32, #tpu.memory_space<vmem>>, vector<8x128xf32>
    %cst_46 = arith.constant dense<0.000000e+00> : vector<8x128xf32>
    %110 = tpu.matmul %107, %3, %cst_46 {dimension_numbers = #tpu.dot_dimension_numbers<[1], [0], [0], [1], [0, 0, 1, 1], [], []>} : vector<8x32xf32>, vector<32x128xf32>, vector<8x128xf32> -> vector<8x128xf32>
    %111 = arith.addf %109, %110 : vector<8x128xf32>
    %112 = arith.negf %111 : vector<8x128xf32>
    %113 = math.exp %112 : vector<8x128xf32>
    %cst_47 = arith.constant 1.000000e+00 : f32
    %114 = vector.broadcast %cst_47 : f32 to vector<8x128xf32>
    %115 = arith.addf %114, %113 : vector<8x128xf32>
    %116 = arith.divf %114, %115 : vector<8x128xf32>
    %117 = math.tanh %111 : vector<8x128xf32>
    %118 = vector.extract_strided_slice %116 {offsets = [0, 0], sizes = [8, 32], strides = [1, 1]} : vector<8x128xf32> to vector<8x32xf32>
    %119 = vector.extract_strided_slice %116 {offsets = [0, 32], sizes = [8, 32], strides = [1, 1]} : vector<8x128xf32> to vector<8x32xf32>
    %120 = vector.extract_strided_slice %117 {offsets = [0, 64], sizes = [8, 32], strides = [1, 1]} : vector<8x128xf32> to vector<8x32xf32>
    %121 = vector.extract_strided_slice %116 {offsets = [0, 96], sizes = [8, 32], strides = [1, 1]} : vector<8x128xf32> to vector<8x32xf32>
    %122 = arith.mulf %119, %105 : vector<8x32xf32>
    %123 = arith.mulf %118, %120 : vector<8x32xf32>
    %124 = arith.addf %122, %123 : vector<8x32xf32>
    %125 = math.tanh %124 : vector<8x32xf32>
    %126 = arith.mulf %121, %125 : vector<8x32xf32>
    %c40_48 = arith.constant 40 : index
    %c0_49 = arith.constant 0 : index
    %127 = vector.load %arg13[%c40_48, %c0_49] : memref<64x32xf32, #tpu.memory_space<vmem>>, vector<8x32xf32>
    tpu.vector_store %arg13[%c40_48, %c0_49], %126 {strides = array<i32>} : memref<64x32xf32, #tpu.memory_space<vmem>>, vector<8x32xf32>,
    %c48 = arith.constant 48 : index
    %c0_50 = arith.constant 0 : index
    %128 = vector.load %arg12[%c48, %c0_50] : memref<64x128xf32, #tpu.memory_space<vmem>>, vector<8x128xf32>
    %cst_51 = arith.constant dense<0.000000e+00> : vector<8x128xf32>
    %129 = tpu.matmul %126, %3, %cst_51 {dimension_numbers = #tpu.dot_dimension_numbers<[1], [0], [0], [1], [0, 0, 1, 1], [], []>} : vector<8x32xf32>, vector<32x128xf32>, vector<8x128xf32> -> vector<8x128xf32>
    %130 = arith.addf %128, %129 : vector<8x128xf32>
    %131 = arith.negf %130 : vector<8x128xf32>
    %132 = math.exp %131 : vector<8x128xf32>
    %cst_52 = arith.constant 1.000000e+00 : f32
    %133 = vector.broadcast %cst_52 : f32 to vector<8x128xf32>
    %134 = arith.addf %133, %132 : vector<8x128xf32>
    %135 = arith.divf %133, %134 : vector<8x128xf32>
    %136 = math.tanh %130 : vector<8x128xf32>
    %137 = vector.extract_strided_slice %135 {offsets = [0, 0], sizes = [8, 32], strides = [1, 1]} : vector<8x128xf32> to vector<8x32xf32>
    %138 = vector.extract_strided_slice %135 {offsets = [0, 32], sizes = [8, 32], strides = [1, 1]} : vector<8x128xf32> to vector<8x32xf32>
    %139 = vector.extract_strided_slice %136 {offsets = [0, 64], sizes = [8, 32], strides = [1, 1]} : vector<8x128xf32> to vector<8x32xf32>
    %140 = vector.extract_strided_slice %135 {offsets = [0, 96], sizes = [8, 32], strides = [1, 1]} : vector<8x128xf32> to vector<8x32xf32>
    %141 = arith.mulf %138, %124 : vector<8x32xf32>
    %142 = arith.mulf %137, %139 : vector<8x32xf32>
    %143 = arith.addf %141, %142 : vector<8x32xf32>
    %144 = math.tanh %143 : vector<8x32xf32>
    %145 = arith.mulf %140, %144 : vector<8x32xf32>
    %c48_53 = arith.constant 48 : index
    %c0_54 = arith.constant 0 : index
    %146 = vector.load %arg13[%c48_53, %c0_54] : memref<64x32xf32, #tpu.memory_space<vmem>>, vector<8x32xf32>
    tpu.vector_store %arg13[%c48_53, %c0_54], %145 {strides = array<i32>} : memref<64x32xf32, #tpu.memory_space<vmem>>, vector<8x32xf32>,
    %c56 = arith.constant 56 : index
    %c0_55 = arith.constant 0 : index
    %147 = vector.load %arg12[%c56, %c0_55] : memref<64x128xf32, #tpu.memory_space<vmem>>, vector<8x128xf32>
    %cst_56 = arith.constant dense<0.000000e+00> : vector<8x128xf32>
    %148 = tpu.matmul %145, %3, %cst_56 {dimension_numbers = #tpu.dot_dimension_numbers<[1], [0], [0], [1], [0, 0, 1, 1], [], []>} : vector<8x32xf32>, vector<32x128xf32>, vector<8x128xf32> -> vector<8x128xf32>
    %149 = arith.addf %147, %148 : vector<8x128xf32>
    %150 = arith.negf %149 : vector<8x128xf32>
    %151 = math.exp %150 : vector<8x128xf32>
    %cst_57 = arith.constant 1.000000e+00 : f32
    %152 = vector.broadcast %cst_57 : f32 to vector<8x128xf32>
    %153 = arith.addf %152, %151 : vector<8x128xf32>
    %154 = arith.divf %152, %153 : vector<8x128xf32>
    %155 = math.tanh %149 : vector<8x128xf32>
    %156 = vector.extract_strided_slice %154 {offsets = [0, 0], sizes = [8, 32], strides = [1, 1]} : vector<8x128xf32> to vector<8x32xf32>
    %157 = vector.extract_strided_slice %154 {offsets = [0, 32], sizes = [8, 32], strides = [1, 1]} : vector<8x128xf32> to vector<8x32xf32>
    %158 = vector.extract_strided_slice %155 {offsets = [0, 64], sizes = [8, 32], strides = [1, 1]} : vector<8x128xf32> to vector<8x32xf32>
    %159 = vector.extract_strided_slice %154 {offsets = [0, 96], sizes = [8, 32], strides = [1, 1]} : vector<8x128xf32> to vector<8x32xf32>
    %160 = arith.mulf %157, %143 : vector<8x32xf32>
    %161 = arith.mulf %156, %158 : vector<8x32xf32>
    %162 = arith.addf %160, %161 : vector<8x32xf32>
    %163 = math.tanh %162 : vector<8x32xf32>
    %164 = arith.mulf %159, %163 : vector<8x32xf32>
    %c56_58 = arith.constant 56 : index
    %c0_59 = arith.constant 0 : index
    %165 = vector.load %arg13[%c56_58, %c0_59] : memref<64x32xf32, #tpu.memory_space<vmem>>, vector<8x32xf32>
    tpu.vector_store %arg13[%c56_58, %c0_59], %164 {strides = array<i32>} : memref<64x32xf32, #tpu.memory_space<vmem>>, vector<8x32xf32>,
    %c0_60 = arith.constant 0 : index
    %c0_61 = arith.constant 0 : index
    %166 = vector.load %arg4[%c0_60, %c0_61] : memref<32x128xf32, #tpu.memory_space<vmem>>, vector<32x128xf32>
    %c0_62 = arith.constant 0 : index
    %c0_63 = arith.constant 0 : index
    %167 = vector.load %arg5[%c0_62, %c0_63] : memref<32x128xf32, #tpu.memory_space<vmem>>, vector<32x128xf32>
    %c0_64 = arith.constant 0 : index
    %c0_65 = arith.constant 0 : index
    %168 = vector.load %arg6[%c0_64, %c0_65] : memref<1x128xf32, #tpu.memory_space<vmem>>, vector<1x128xf32>
    %c0_66 = arith.constant 0 : index
    %c0_67 = arith.constant 0 : index
    %169 = vector.load %arg13[%c0_66, %c0_67] : memref<64x32xf32, #tpu.memory_space<vmem>>, vector<64x32xf32>
    %cst_68 = arith.constant dense<0.000000e+00> : vector<64x128xf32>
    %170 = tpu.matmul %169, %166, %cst_68 {dimension_numbers = #tpu.dot_dimension_numbers<[1], [0], [0], [1], [0, 0, 1, 1], [], []>} : vector<64x32xf32>, vector<32x128xf32>, vector<64x128xf32> -> vector<64x128xf32>
    %171 = vector.broadcast %168 : vector<1x128xf32> to vector<64x128xf32>
    %172 = arith.addf %170, %171 : vector<64x128xf32>
    %c0_69 = arith.constant 0 : index
    %c0_70 = arith.constant 0 : index
    %173 = vector.load %arg12[%c0_69, %c0_70] : memref<64x128xf32, #tpu.memory_space<vmem>>, vector<64x128xf32>
    tpu.vector_store %arg12[%c0_69, %c0_70], %172 {strides = array<i32>} : memref<64x128xf32, #tpu.memory_space<vmem>>, vector<64x128xf32>,
    %c1 = arith.constant 1 : index
    %c0_71 = arith.constant 0 : index
    %c0_72 = arith.constant 0 : index
    %174 = vector.load %arg7[%c1, %c0_71, %c0_72] : memref<2x8x32xf32, #tpu.memory_space<vmem>>, vector<1x8x32xf32>
    %175 = vector.shape_cast %174 : vector<1x8x32xf32> to vector<8x32xf32>
    %c1_73 = arith.constant 1 : index
    %c0_74 = arith.constant 0 : index
    %c0_75 = arith.constant 0 : index
    %176 = vector.load %arg8[%c1_73, %c0_74, %c0_75] : memref<2x8x32xf32, #tpu.memory_space<vmem>>, vector<1x8x32xf32>
    %177 = vector.shape_cast %176 : vector<1x8x32xf32> to vector<8x32xf32>
    %c0_76 = arith.constant 0 : index
    %c0_77 = arith.constant 0 : index
    %178 = vector.load %arg12[%c0_76, %c0_77] : memref<64x128xf32, #tpu.memory_space<vmem>>, vector<8x128xf32>
    %cst_78 = arith.constant dense<0.000000e+00> : vector<8x128xf32>
    %179 = tpu.matmul %175, %167, %cst_78 {dimension_numbers = #tpu.dot_dimension_numbers<[1], [0], [0], [1], [0, 0, 1, 1], [], []>} : vector<8x32xf32>, vector<32x128xf32>, vector<8x128xf32> -> vector<8x128xf32>
    %180 = arith.addf %178, %179 : vector<8x128xf32>
    %181 = arith.negf %180 : vector<8x128xf32>
    %182 = math.exp %181 : vector<8x128xf32>
    %cst_79 = arith.constant 1.000000e+00 : f32
    %183 = vector.broadcast %cst_79 : f32 to vector<8x128xf32>
    %184 = arith.addf %183, %182 : vector<8x128xf32>
    %185 = arith.divf %183, %184 : vector<8x128xf32>
    %186 = math.tanh %180 : vector<8x128xf32>
    %187 = vector.extract_strided_slice %185 {offsets = [0, 0], sizes = [8, 32], strides = [1, 1]} : vector<8x128xf32> to vector<8x32xf32>
    %188 = vector.extract_strided_slice %185 {offsets = [0, 32], sizes = [8, 32], strides = [1, 1]} : vector<8x128xf32> to vector<8x32xf32>
    %189 = vector.extract_strided_slice %186 {offsets = [0, 64], sizes = [8, 32], strides = [1, 1]} : vector<8x128xf32> to vector<8x32xf32>
    %190 = vector.extract_strided_slice %185 {offsets = [0, 96], sizes = [8, 32], strides = [1, 1]} : vector<8x128xf32> to vector<8x32xf32>
    %191 = arith.mulf %188, %177 : vector<8x32xf32>
    %192 = arith.mulf %187, %189 : vector<8x32xf32>
    %193 = arith.addf %191, %192 : vector<8x32xf32>
    %194 = math.tanh %193 : vector<8x32xf32>
    %195 = arith.mulf %190, %194 : vector<8x32xf32>
    %cst_80 = arith.constant dense<0.000000e+00> : vector<8x1xf32>
    %196 = tpu.matmul %195, %0, %cst_80 {dimension_numbers = #tpu.dot_dimension_numbers<[1], [0], [0], [1], [0, 0, 1, 1], [], []>} : vector<8x32xf32>, vector<32x1xf32>, vector<8x1xf32> -> vector<8x1xf32>
    %197 = vector.broadcast %1 : vector<1x1xf32> to vector<8x1xf32>
    %198 = arith.addf %196, %197 : vector<8x1xf32>
    %c0_81 = arith.constant 0 : index
    %c0_82 = arith.constant 0 : index
    %199 = vector.load %arg11[%c0_81, %c0_82] : memref<8x8xf32, #tpu.memory_space<vmem>>, vector<8x1xf32>
    tpu.vector_store %arg11[%c0_81, %c0_82], %198 {strides = array<i32>} : memref<8x8xf32, #tpu.memory_space<vmem>>, vector<8x1xf32>,
    %c8_83 = arith.constant 8 : index
    %c0_84 = arith.constant 0 : index
    %200 = vector.load %arg12[%c8_83, %c0_84] : memref<64x128xf32, #tpu.memory_space<vmem>>, vector<8x128xf32>
    %cst_85 = arith.constant dense<0.000000e+00> : vector<8x128xf32>
    %201 = tpu.matmul %195, %167, %cst_85 {dimension_numbers = #tpu.dot_dimension_numbers<[1], [0], [0], [1], [0, 0, 1, 1], [], []>} : vector<8x32xf32>, vector<32x128xf32>, vector<8x128xf32> -> vector<8x128xf32>
    %202 = arith.addf %200, %201 : vector<8x128xf32>
    %203 = arith.negf %202 : vector<8x128xf32>
    %204 = math.exp %203 : vector<8x128xf32>
    %cst_86 = arith.constant 1.000000e+00 : f32
    %205 = vector.broadcast %cst_86 : f32 to vector<8x128xf32>
    %206 = arith.addf %205, %204 : vector<8x128xf32>
    %207 = arith.divf %205, %206 : vector<8x128xf32>
    %208 = math.tanh %202 : vector<8x128xf32>
    %209 = vector.extract_strided_slice %207 {offsets = [0, 0], sizes = [8, 32], strides = [1, 1]} : vector<8x128xf32> to vector<8x32xf32>
    %210 = vector.extract_strided_slice %207 {offsets = [0, 32], sizes = [8, 32], strides = [1, 1]} : vector<8x128xf32> to vector<8x32xf32>
    %211 = vector.extract_strided_slice %208 {offsets = [0, 64], sizes = [8, 32], strides = [1, 1]} : vector<8x128xf32> to vector<8x32xf32>
    %212 = vector.extract_strided_slice %207 {offsets = [0, 96], sizes = [8, 32], strides = [1, 1]} : vector<8x128xf32> to vector<8x32xf32>
    %213 = arith.mulf %210, %193 : vector<8x32xf32>
    %214 = arith.mulf %209, %211 : vector<8x32xf32>
    %215 = arith.addf %213, %214 : vector<8x32xf32>
    %216 = math.tanh %215 : vector<8x32xf32>
    %217 = arith.mulf %212, %216 : vector<8x32xf32>
    %cst_87 = arith.constant dense<0.000000e+00> : vector<8x1xf32>
    %218 = tpu.matmul %217, %0, %cst_87 {dimension_numbers = #tpu.dot_dimension_numbers<[1], [0], [0], [1], [0, 0, 1, 1], [], []>} : vector<8x32xf32>, vector<32x1xf32>, vector<8x1xf32> -> vector<8x1xf32>
    %219 = vector.broadcast %1 : vector<1x1xf32> to vector<8x1xf32>
    %220 = arith.addf %218, %219 : vector<8x1xf32>
    %c0_88 = arith.constant 0 : index
    %c1_89 = arith.constant 1 : index
    %221 = vector.load %arg11[%c0_88, %c1_89] : memref<8x8xf32, #tpu.memory_space<vmem>>, vector<8x1xf32>
    tpu.vector_store %arg11[%c0_88, %c1_89], %220 {strides = array<i32>} : memref<8x8xf32, #tpu.memory_space<vmem>>, vector<8x1xf32>,
    %c16_90 = arith.constant 16 : index
    %c0_91 = arith.constant 0 : index
    %222 = vector.load %arg12[%c16_90, %c0_91] : memref<64x128xf32, #tpu.memory_space<vmem>>, vector<8x128xf32>
    %cst_92 = arith.constant dense<0.000000e+00> : vector<8x128xf32>
    %223 = tpu.matmul %217, %167, %cst_92 {dimension_numbers = #tpu.dot_dimension_numbers<[1], [0], [0], [1], [0, 0, 1, 1], [], []>} : vector<8x32xf32>, vector<32x128xf32>, vector<8x128xf32> -> vector<8x128xf32>
    %224 = arith.addf %222, %223 : vector<8x128xf32>
    %225 = arith.negf %224 : vector<8x128xf32>
    %226 = math.exp %225 : vector<8x128xf32>
    %cst_93 = arith.constant 1.000000e+00 : f32
    %227 = vector.broadcast %cst_93 : f32 to vector<8x128xf32>
    %228 = arith.addf %227, %226 : vector<8x128xf32>
    %229 = arith.divf %227, %228 : vector<8x128xf32>
    %230 = math.tanh %224 : vector<8x128xf32>
    %231 = vector.extract_strided_slice %229 {offsets = [0, 0], sizes = [8, 32], strides = [1, 1]} : vector<8x128xf32> to vector<8x32xf32>
    %232 = vector.extract_strided_slice %229 {offsets = [0, 32], sizes = [8, 32], strides = [1, 1]} : vector<8x128xf32> to vector<8x32xf32>
    %233 = vector.extract_strided_slice %230 {offsets = [0, 64], sizes = [8, 32], strides = [1, 1]} : vector<8x128xf32> to vector<8x32xf32>
    %234 = vector.extract_strided_slice %229 {offsets = [0, 96], sizes = [8, 32], strides = [1, 1]} : vector<8x128xf32> to vector<8x32xf32>
    %235 = arith.mulf %232, %215 : vector<8x32xf32>
    %236 = arith.mulf %231, %233 : vector<8x32xf32>
    %237 = arith.addf %235, %236 : vector<8x32xf32>
    %238 = math.tanh %237 : vector<8x32xf32>
    %239 = arith.mulf %234, %238 : vector<8x32xf32>
    %cst_94 = arith.constant dense<0.000000e+00> : vector<8x1xf32>
    %240 = tpu.matmul %239, %0, %cst_94 {dimension_numbers = #tpu.dot_dimension_numbers<[1], [0], [0], [1], [0, 0, 1, 1], [], []>} : vector<8x32xf32>, vector<32x1xf32>, vector<8x1xf32> -> vector<8x1xf32>
    %241 = vector.broadcast %1 : vector<1x1xf32> to vector<8x1xf32>
    %242 = arith.addf %240, %241 : vector<8x1xf32>
    %c0_95 = arith.constant 0 : index
    %c2 = arith.constant 2 : index
    %243 = vector.load %arg11[%c0_95, %c2] : memref<8x8xf32, #tpu.memory_space<vmem>>, vector<8x1xf32>
    tpu.vector_store %arg11[%c0_95, %c2], %242 {strides = array<i32>} : memref<8x8xf32, #tpu.memory_space<vmem>>, vector<8x1xf32>,
    %c24_96 = arith.constant 24 : index
    %c0_97 = arith.constant 0 : index
    %244 = vector.load %arg12[%c24_96, %c0_97] : memref<64x128xf32, #tpu.memory_space<vmem>>, vector<8x128xf32>
    %cst_98 = arith.constant dense<0.000000e+00> : vector<8x128xf32>
    %245 = tpu.matmul %239, %167, %cst_98 {dimension_numbers = #tpu.dot_dimension_numbers<[1], [0], [0], [1], [0, 0, 1, 1], [], []>} : vector<8x32xf32>, vector<32x128xf32>, vector<8x128xf32> -> vector<8x128xf32>
    %246 = arith.addf %244, %245 : vector<8x128xf32>
    %247 = arith.negf %246 : vector<8x128xf32>
    %248 = math.exp %247 : vector<8x128xf32>
    %cst_99 = arith.constant 1.000000e+00 : f32
    %249 = vector.broadcast %cst_99 : f32 to vector<8x128xf32>
    %250 = arith.addf %249, %248 : vector<8x128xf32>
    %251 = arith.divf %249, %250 : vector<8x128xf32>
    %252 = math.tanh %246 : vector<8x128xf32>
    %253 = vector.extract_strided_slice %251 {offsets = [0, 0], sizes = [8, 32], strides = [1, 1]} : vector<8x128xf32> to vector<8x32xf32>
    %254 = vector.extract_strided_slice %251 {offsets = [0, 32], sizes = [8, 32], strides = [1, 1]} : vector<8x128xf32> to vector<8x32xf32>
    %255 = vector.extract_strided_slice %252 {offsets = [0, 64], sizes = [8, 32], strides = [1, 1]} : vector<8x128xf32> to vector<8x32xf32>
    %256 = vector.extract_strided_slice %251 {offsets = [0, 96], sizes = [8, 32], strides = [1, 1]} : vector<8x128xf32> to vector<8x32xf32>
    %257 = arith.mulf %254, %237 : vector<8x32xf32>
    %258 = arith.mulf %253, %255 : vector<8x32xf32>
    %259 = arith.addf %257, %258 : vector<8x32xf32>
    %260 = math.tanh %259 : vector<8x32xf32>
    %261 = arith.mulf %256, %260 : vector<8x32xf32>
    %cst_100 = arith.constant dense<0.000000e+00> : vector<8x1xf32>
    %262 = tpu.matmul %261, %0, %cst_100 {dimension_numbers = #tpu.dot_dimension_numbers<[1], [0], [0], [1], [0, 0, 1, 1], [], []>} : vector<8x32xf32>, vector<32x1xf32>, vector<8x1xf32> -> vector<8x1xf32>
    %263 = vector.broadcast %1 : vector<1x1xf32> to vector<8x1xf32>
    %264 = arith.addf %262, %263 : vector<8x1xf32>
    %c0_101 = arith.constant 0 : index
    %c3 = arith.constant 3 : index
    %265 = vector.load %arg11[%c0_101, %c3] : memref<8x8xf32, #tpu.memory_space<vmem>>, vector<8x1xf32>
    tpu.vector_store %arg11[%c0_101, %c3], %264 {strides = array<i32>} : memref<8x8xf32, #tpu.memory_space<vmem>>, vector<8x1xf32>,
    %c32_102 = arith.constant 32 : index
    %c0_103 = arith.constant 0 : index
    %266 = vector.load %arg12[%c32_102, %c0_103] : memref<64x128xf32, #tpu.memory_space<vmem>>, vector<8x128xf32>
    %cst_104 = arith.constant dense<0.000000e+00> : vector<8x128xf32>
    %267 = tpu.matmul %261, %167, %cst_104 {dimension_numbers = #tpu.dot_dimension_numbers<[1], [0], [0], [1], [0, 0, 1, 1], [], []>} : vector<8x32xf32>, vector<32x128xf32>, vector<8x128xf32> -> vector<8x128xf32>
    %268 = arith.addf %266, %267 : vector<8x128xf32>
    %269 = arith.negf %268 : vector<8x128xf32>
    %270 = math.exp %269 : vector<8x128xf32>
    %cst_105 = arith.constant 1.000000e+00 : f32
    %271 = vector.broadcast %cst_105 : f32 to vector<8x128xf32>
    %272 = arith.addf %271, %270 : vector<8x128xf32>
    %273 = arith.divf %271, %272 : vector<8x128xf32>
    %274 = math.tanh %268 : vector<8x128xf32>
    %275 = vector.extract_strided_slice %273 {offsets = [0, 0], sizes = [8, 32], strides = [1, 1]} : vector<8x128xf32> to vector<8x32xf32>
    %276 = vector.extract_strided_slice %273 {offsets = [0, 32], sizes = [8, 32], strides = [1, 1]} : vector<8x128xf32> to vector<8x32xf32>
    %277 = vector.extract_strided_slice %274 {offsets = [0, 64], sizes = [8, 32], strides = [1, 1]} : vector<8x128xf32> to vector<8x32xf32>
    %278 = vector.extract_strided_slice %273 {offsets = [0, 96], sizes = [8, 32], strides = [1, 1]} : vector<8x128xf32> to vector<8x32xf32>
    %279 = arith.mulf %276, %259 : vector<8x32xf32>
    %280 = arith.mulf %275, %277 : vector<8x32xf32>
    %281 = arith.addf %279, %280 : vector<8x32xf32>
    %282 = math.tanh %281 : vector<8x32xf32>
    %283 = arith.mulf %278, %282 : vector<8x32xf32>
    %cst_106 = arith.constant dense<0.000000e+00> : vector<8x1xf32>
    %284 = tpu.matmul %283, %0, %cst_106 {dimension_numbers = #tpu.dot_dimension_numbers<[1], [0], [0], [1], [0, 0, 1, 1], [], []>} : vector<8x32xf32>, vector<32x1xf32>, vector<8x1xf32> -> vector<8x1xf32>
    %285 = vector.broadcast %1 : vector<1x1xf32> to vector<8x1xf32>
    %286 = arith.addf %284, %285 : vector<8x1xf32>
    %c0_107 = arith.constant 0 : index
    %c4 = arith.constant 4 : index
    %287 = vector.load %arg11[%c0_107, %c4] : memref<8x8xf32, #tpu.memory_space<vmem>>, vector<8x1xf32>
    tpu.vector_store %arg11[%c0_107, %c4], %286 {strides = array<i32>} : memref<8x8xf32, #tpu.memory_space<vmem>>, vector<8x1xf32>,
    %c40_108 = arith.constant 40 : index
    %c0_109 = arith.constant 0 : index
    %288 = vector.load %arg12[%c40_108, %c0_109] : memref<64x128xf32, #tpu.memory_space<vmem>>, vector<8x128xf32>
    %cst_110 = arith.constant dense<0.000000e+00> : vector<8x128xf32>
    %289 = tpu.matmul %283, %167, %cst_110 {dimension_numbers = #tpu.dot_dimension_numbers<[1], [0], [0], [1], [0, 0, 1, 1], [], []>} : vector<8x32xf32>, vector<32x128xf32>, vector<8x128xf32> -> vector<8x128xf32>
    %290 = arith.addf %288, %289 : vector<8x128xf32>
    %291 = arith.negf %290 : vector<8x128xf32>
    %292 = math.exp %291 : vector<8x128xf32>
    %cst_111 = arith.constant 1.000000e+00 : f32
    %293 = vector.broadcast %cst_111 : f32 to vector<8x128xf32>
    %294 = arith.addf %293, %292 : vector<8x128xf32>
    %295 = arith.divf %293, %294 : vector<8x128xf32>
    %296 = math.tanh %290 : vector<8x128xf32>
    %297 = vector.extract_strided_slice %295 {offsets = [0, 0], sizes = [8, 32], strides = [1, 1]} : vector<8x128xf32> to vector<8x32xf32>
    %298 = vector.extract_strided_slice %295 {offsets = [0, 32], sizes = [8, 32], strides = [1, 1]} : vector<8x128xf32> to vector<8x32xf32>
    %299 = vector.extract_strided_slice %296 {offsets = [0, 64], sizes = [8, 32], strides = [1, 1]} : vector<8x128xf32> to vector<8x32xf32>
    %300 = vector.extract_strided_slice %295 {offsets = [0, 96], sizes = [8, 32], strides = [1, 1]} : vector<8x128xf32> to vector<8x32xf32>
    %301 = arith.mulf %298, %281 : vector<8x32xf32>
    %302 = arith.mulf %297, %299 : vector<8x32xf32>
    %303 = arith.addf %301, %302 : vector<8x32xf32>
    %304 = math.tanh %303 : vector<8x32xf32>
    %305 = arith.mulf %300, %304 : vector<8x32xf32>
    %cst_112 = arith.constant dense<0.000000e+00> : vector<8x1xf32>
    %306 = tpu.matmul %305, %0, %cst_112 {dimension_numbers = #tpu.dot_dimension_numbers<[1], [0], [0], [1], [0, 0, 1, 1], [], []>} : vector<8x32xf32>, vector<32x1xf32>, vector<8x1xf32> -> vector<8x1xf32>
    %307 = vector.broadcast %1 : vector<1x1xf32> to vector<8x1xf32>
    %308 = arith.addf %306, %307 : vector<8x1xf32>
    %c0_113 = arith.constant 0 : index
    %c5 = arith.constant 5 : index
    %309 = vector.load %arg11[%c0_113, %c5] : memref<8x8xf32, #tpu.memory_space<vmem>>, vector<8x1xf32>
    tpu.vector_store %arg11[%c0_113, %c5], %308 {strides = array<i32>} : memref<8x8xf32, #tpu.memory_space<vmem>>, vector<8x1xf32>,
    %c48_114 = arith.constant 48 : index
    %c0_115 = arith.constant 0 : index
    %310 = vector.load %arg12[%c48_114, %c0_115] : memref<64x128xf32, #tpu.memory_space<vmem>>, vector<8x128xf32>
    %cst_116 = arith.constant dense<0.000000e+00> : vector<8x128xf32>
    %311 = tpu.matmul %305, %167, %cst_116 {dimension_numbers = #tpu.dot_dimension_numbers<[1], [0], [0], [1], [0, 0, 1, 1], [], []>} : vector<8x32xf32>, vector<32x128xf32>, vector<8x128xf32> -> vector<8x128xf32>
    %312 = arith.addf %310, %311 : vector<8x128xf32>
    %313 = arith.negf %312 : vector<8x128xf32>
    %314 = math.exp %313 : vector<8x128xf32>
    %cst_117 = arith.constant 1.000000e+00 : f32
    %315 = vector.broadcast %cst_117 : f32 to vector<8x128xf32>
    %316 = arith.addf %315, %314 : vector<8x128xf32>
    %317 = arith.divf %315, %316 : vector<8x128xf32>
    %318 = math.tanh %312 : vector<8x128xf32>
    %319 = vector.extract_strided_slice %317 {offsets = [0, 0], sizes = [8, 32], strides = [1, 1]} : vector<8x128xf32> to vector<8x32xf32>
    %320 = vector.extract_strided_slice %317 {offsets = [0, 32], sizes = [8, 32], strides = [1, 1]} : vector<8x128xf32> to vector<8x32xf32>
    %321 = vector.extract_strided_slice %318 {offsets = [0, 64], sizes = [8, 32], strides = [1, 1]} : vector<8x128xf32> to vector<8x32xf32>
    %322 = vector.extract_strided_slice %317 {offsets = [0, 96], sizes = [8, 32], strides = [1, 1]} : vector<8x128xf32> to vector<8x32xf32>
    %323 = arith.mulf %320, %303 : vector<8x32xf32>
    %324 = arith.mulf %319, %321 : vector<8x32xf32>
    %325 = arith.addf %323, %324 : vector<8x32xf32>
    %326 = math.tanh %325 : vector<8x32xf32>
    %327 = arith.mulf %322, %326 : vector<8x32xf32>
    %cst_118 = arith.constant dense<0.000000e+00> : vector<8x1xf32>
    %328 = tpu.matmul %327, %0, %cst_118 {dimension_numbers = #tpu.dot_dimension_numbers<[1], [0], [0], [1], [0, 0, 1, 1], [], []>} : vector<8x32xf32>, vector<32x1xf32>, vector<8x1xf32> -> vector<8x1xf32>
    %329 = vector.broadcast %1 : vector<1x1xf32> to vector<8x1xf32>
    %330 = arith.addf %328, %329 : vector<8x1xf32>
    %c0_119 = arith.constant 0 : index
    %c6 = arith.constant 6 : index
    %331 = vector.load %arg11[%c0_119, %c6] : memref<8x8xf32, #tpu.memory_space<vmem>>, vector<8x1xf32>
    tpu.vector_store %arg11[%c0_119, %c6], %330 {strides = array<i32>} : memref<8x8xf32, #tpu.memory_space<vmem>>, vector<8x1xf32>,
    %c56_120 = arith.constant 56 : index
    %c0_121 = arith.constant 0 : index
    %332 = vector.load %arg12[%c56_120, %c0_121] : memref<64x128xf32, #tpu.memory_space<vmem>>, vector<8x128xf32>
    %cst_122 = arith.constant dense<0.000000e+00> : vector<8x128xf32>
    %333 = tpu.matmul %327, %167, %cst_122 {dimension_numbers = #tpu.dot_dimension_numbers<[1], [0], [0], [1], [0, 0, 1, 1], [], []>} : vector<8x32xf32>, vector<32x128xf32>, vector<8x128xf32> -> vector<8x128xf32>
    %334 = arith.addf %332, %333 : vector<8x128xf32>
    %335 = arith.negf %334 : vector<8x128xf32>
    %336 = math.exp %335 : vector<8x128xf32>
    %cst_123 = arith.constant 1.000000e+00 : f32
    %337 = vector.broadcast %cst_123 : f32 to vector<8x128xf32>
    %338 = arith.addf %337, %336 : vector<8x128xf32>
    %339 = arith.divf %337, %338 : vector<8x128xf32>
    %340 = math.tanh %334 : vector<8x128xf32>
    %341 = vector.extract_strided_slice %339 {offsets = [0, 0], sizes = [8, 32], strides = [1, 1]} : vector<8x128xf32> to vector<8x32xf32>
    %342 = vector.extract_strided_slice %339 {offsets = [0, 32], sizes = [8, 32], strides = [1, 1]} : vector<8x128xf32> to vector<8x32xf32>
    %343 = vector.extract_strided_slice %340 {offsets = [0, 64], sizes = [8, 32], strides = [1, 1]} : vector<8x128xf32> to vector<8x32xf32>
    %344 = vector.extract_strided_slice %339 {offsets = [0, 96], sizes = [8, 32], strides = [1, 1]} : vector<8x128xf32> to vector<8x32xf32>
    %345 = arith.mulf %342, %325 : vector<8x32xf32>
    %346 = arith.mulf %341, %343 : vector<8x32xf32>
    %347 = arith.addf %345, %346 : vector<8x32xf32>
    %348 = math.tanh %347 : vector<8x32xf32>
    %349 = arith.mulf %344, %348 : vector<8x32xf32>
    %cst_124 = arith.constant dense<0.000000e+00> : vector<8x1xf32>
    %350 = tpu.matmul %349, %0, %cst_124 {dimension_numbers = #tpu.dot_dimension_numbers<[1], [0], [0], [1], [0, 0, 1, 1], [], []>} : vector<8x32xf32>, vector<32x1xf32>, vector<8x1xf32> -> vector<8x1xf32>
    %351 = vector.broadcast %1 : vector<1x1xf32> to vector<8x1xf32>
    %352 = arith.addf %350, %351 : vector<8x1xf32>
    %c0_125 = arith.constant 0 : index
    %c7 = arith.constant 7 : index
    %353 = vector.load %arg11[%c0_125, %c7] : memref<8x8xf32, #tpu.memory_space<vmem>>, vector<8x1xf32>
    tpu.vector_store %arg11[%c0_125, %c7], %352 {strides = array<i32>} : memref<8x8xf32, #tpu.memory_space<vmem>>, vector<8x1xf32>,
    return
  }
}

</mosaic_0001>

<bundles_post_ra>
// kernel: lstm_net_forward.1
= control target key start
LH: loop header
LB: loop body
LE: loop exit
PB: predicated region body
PF: predicated region fallthrough
CT: control target
= control target key end

     0   :  { %vm87_vm0 = vcmask 1043456   ;;  %vm62_vm1 = vcmask 31744   ;;  %vm143_vm2 = vcmask 261120   ;;  %s1703_s12 = smov 64   ;;  %s1704_s15 = smov 32   ;;  %s2202_s2 = inlined_call_operand.vmem [shape: f32[32,128], index: 2, kind: input, shape index: {}]   ;;  %s2203_s1 = inlined_call_operand.vmem [shape: f32[4,128], index: 1, kind: input, shape index: {}]   ;;  %s2204_s0 = inlined_call_operand.vmem [shape: f32[64,4], index: 0, kind: input, shape index: {}]   ;;  %s2205_s3 = inlined_call_operand.vmem [shape: f32[1,128], index: 3, kind: input, shape index: {}]   ;;  %s2206_s7 = inlined_call_operand.vmem [shape: f32[2,8,32], index: 7, kind: input, shape index: {}]   ;;  %s2207_s8 = inlined_call_operand.vmem [shape: f32[2,8,32], index: 8, kind: input, shape index: {}]   ;;  %s2208_s4 = inlined_call_operand.vmem [shape: f32[32,128], index: 4, kind: input, shape index: {}]   ;;  %s2209_s6 = inlined_call_operand.vmem [shape: f32[1,128], index: 6, kind: input, shape index: {}]   ;;  %s2210_s5 = inlined_call_operand.vmem [shape: f32[32,128], index: 5, kind: input, shape index: {}]   ;;  %s2211_s9 = inlined_call_operand.vmem [shape: f32[32,1], index: 9, kind: input, shape index: {}]   ;;  %s2212_s10 = inlined_call_operand.<no memory space> [shape: f32[1,1], index: 10, kind: input, shape index: {}]   ;;  %s2213_s11 = inlined_call_operand.vmem [shape: f32[8,8], index: 11, kind: output, shape index: {}]  }
   0x1   :  { %v1775_v0 = vld [vmem:[%s2202_s2 + $0x18] sm:$0xff]  ;;  %v1780_v1 = vld [vmem:[%s2202_s2 + $0x10] sm:$0xff]  ;;  %v45_v2 = vld [vmem:[%s2203_s1] sm:$0xf]  ;;  %s1706_s19 = smov 4   ;;  %s1707_s22 = smov 2  }
   0x2   :  { %159 = vmatpush.msra.mxu1 %v1775_v0  ;;  %1503 = vmatpush.msk.msra.mxu0 %vm87_vm0, %v45_v2  ;;  %v51_v3 = vld [vmem:[%s2204_s0] sm:$0xff]  ;;  %v1792_v4 = vld [vmem:[%s2202_s2 + $0x8] sm:$0xff]  ;;  %s1708_s23 = smov 5   ;;  %s1709_s25 = smov 3  }
   0x3   :  { %1504 = vmatmul.msk.f32.vlgmr.msra.gmra.mxu0 %vm62_vm1, %v51_v3  ;;  %229 = vmatpush.msra.mxu2 %v1775_v0  ;;  %v1801_v5 = vld [vmem:[%s2202_s2] sm:$0xff]  ;;  %v52_v36 = vld [vmem:[%s2204_s0 + $0x8] sm:$0xff]  ;;  %s1711_s28 = smov 7  }
   0x4   :  { %160 = vmatpush.msra.mxu1 %v1780_v1  ;;  %295 = vmatpush.msra.mxu3 %v1775_v0  ;;  %v140_v6 = vld [vmem:[%s2206_s7] sm:$0xff] }
   0x5   :  { %230 = vmatpush.msra.mxu2 %v1780_v1  ;;  %v1834_v7 = vld [vmem:[%s2205_s3] ss:$0 sm:$0xff] }
   0x6   :  { %161 = vmatpush.msra.mxu1 %v1792_v4  ;;  %296 = vmatpush.msra.mxu3 %v1780_v1  ;;  %v141_v13 = vld [vmem:[%s2207_s8] sm:$0xff] }
   0x7   :  { %231 = vmatpush.msra.mxu2 %v1792_v4 }
   0x8   :  { %162 = vmatpush.msra.mxu1 %v1801_v5  ;;  %297 = vmatpush.msra.mxu3 %v1792_v4 }
   0x9   :  { %1512 = vmatmul.msk.f32.vlgmr.msra.gmra.mxu1 %vm143_vm2, %v140_v6  ;;  %232 = vmatpush.msra.mxu2 %v1801_v5 }
   0xa   :  { %298 = vmatpush.msra.mxu3 %v1801_v5  ;;  %361 = vmatpush.msrb.mxu1 %v1775_v0 }
   0xb   :  { %427 = vmatpush.msrb.mxu2 %v1775_v0  ;;  %1505 = vmatmul.msk.f32.gmra.mxu0 %vm62_vm1, %v52_v36 }
   0xc   :  { %493 = vmatpush.msrb.mxu3 %v1775_v0  ;;  %362 = vmatpush.msrb.mxu1 %v1780_v1 }
   0xd   :  { %428 = vmatpush.msrb.mxu2 %v1780_v1 }
   0xe   :  { %494 = vmatpush.msrb.mxu3 %v1780_v1  ;;  %363 = vmatpush.msrb.mxu1 %v1792_v4 }
   0xf   :  { %429 = vmatpush.msrb.mxu2 %v1792_v4 }
  0x10   :  { %495 = vmatpush.msrb.mxu3 %v1792_v4  ;;  %364 = vmatpush.msrb.mxu1 %v1801_v5 }
  0x11   :  { %430 = vmatpush.msrb.mxu2 %v1801_v5 }
  0x12   :  { %496 = vmatpush.msrb.mxu3 %v1801_v5  ;;  %559 = vmatpush.msra.mxu1 %v1775_v0 }
  0x14   :  { %560 = vmatpush.msra.mxu1 %v1780_v1 }
  0x16   :  { %561 = vmatpush.msra.mxu1 %v1792_v4 }
  0x18   :  { %562 = vmatpush.msra.mxu1 %v1801_v5 }
  0x80   :  { %v108_v8 = vpop.f32.mrf.mxu0 }
  0x81   :  { %v109_v9 = vadd.f32 %v1834_v7, %v108_v8 }
  0x86   :  { %v164_v10 = vpop.f32.mrf.mxu1 }
  0x87   :  { %v167_v11 = vadd.f32 %v164_v10, %v109_v9 }
  0x88   :  { %v111_v38 = vpop.f32.mrf.mxu0 }
  0x89   :  { %1574 = vtanh.f32 %v167_v11  ;;  %v1513_v14 = vmul.f32 -1.442695, %v167_v11  ;;  %v112_v39 = vadd.f32 %v1834_v7, %v111_v38 }
  0x8b   :  { %1576 = vpow2.f32 %v1513_v14 }
  0x8f   :  { %v1575_v12 = vpop.eup %1574 }
  0x90   :  { %194 = vrot.lane.b32.xlu0 %v1575_v12, %s1703_s12 }
  0x91   :  { %v1577_v15 = vpop.eup %1576 }
  0x92   :  { %v171_v16 = vadd.f32 1.0, %v1577_v15 }
  0x94   :  { %1578 = vrcp.f32 %v171_v16  ;;  %v183_v22 = vand.u32 2147483648, %v171_v16  ;;  %vm177_vm4 = vweird.f32 %v171_v16  ;;  %v181_v23 = vand.u32 2147483647, %v171_v16 }
  0x96   :  { %v184_v25 = vor.u32 1.1754944e-38, %v183_v22  ;;  %vm182_vm6 = vcmp.eq.f32.partialorder %v181_v23, 8.507059e+37 }
  0x98   :  { %189 = vrot.lane.b32.xlu0 %v141_v13, %s1704_s15 }
  0x9a   :  { %v1579_v17 = vpop.eup %1578 }
  0x9b   :  { %v173_v18 = vmul.f32 %v1579_v17, %v171_v16  ;;  %vm178_vm3 = vweird.f32 %v1579_v17 }
  0x9c   :  { %vm179_vm5 = vmor %vm177_vm4, %vm178_vm3 }
  0x9d   :  { %v174_v19 = vsub.f32 1.0, %v173_v18 }
  0x9f   :  { %v175_v20 = vmul.f32 %v1579_v17, %v174_v19 }
  0xa1   :  { %v176_v21 = vadd.f32 %v1579_v17, %v175_v20 }
  0xa3   :  { %v180_v24 = vsel %vm179_vm5, %v1579_v17, %v176_v21 }
  0xa4   :  { %v185_v27 = vsel %vm182_vm6, %v184_v25, %v180_v24 }
 0x102   :  { %v195_v26 = vpop.permute.xlu0 %194 }
 0x103   :  { %v197_v28 = vmul.f32 %v195_v26, %v185_v27 }
 0x105   :  { %199 = vrot.lane.b32.xlu1 %v197_v28, %s1704_s15 }
 0x10a   :  { %v190_v29 = vpop.permute.xlu0 %189 }
 0x10b   :  { %v192_v30 = vmul.f32 %v190_v29, %v185_v27 }
 0x177   :  { %v200_v31 = vpop.permute.xlu1 %199 }
 0x178   :  { %v202_v32 = vadd.f32 %v200_v31, %v192_v30 }
 0x17a   :  { %1580 = vtanh.f32 %v202_v32 }
 0x180   :  { %v1581_v33 = vpop.eup %1580 }
 0x181   :  { %205 = vrot.lane.b32.xlu1 %v1581_v33, %s1703_s12 }
 0x1f3   :  { %v206_v34 = vpop.permute.xlu1 %205 }
 0x1f4   :  { %v208_v35 = vmul.f32 %v206_v34, %v185_v27  ;;  %v54_v27 = vld [vmem:[%s2204_s0 + $0x18] sm:$0xff] }
 0x1f6   :  { %210 = vrot.lane.b32.xlu2 %v208_v35, %s1704_s15 }
 0x250   :  { %v211_v37 = vpop.permute.xlu2 %210 }
 0x251   :  { %213 = vst.msk [vmem:[#allocation3] sm:$0xff] %vm143_vm2, %v211_v37  ;;  %1514 = vmatmul.msk.f32.vlgmr.msra.gmra.mxu2 %vm143_vm2, %v211_v37 }
 0x252   :  { %625 = vmatpush.msra.mxu2 %v1775_v0  ;;  %v53_v0 = vld [vmem:[%s2204_s0 + $0x10] sm:$0xff] }
 0x253   :  { %1506 = vmatmul.msk.f32.gmra.mxu0 %vm62_vm1, %v53_v0 }
 0x254   :  { %626 = vmatpush.msra.mxu2 %v1780_v1 }
 0x256   :  { %627 = vmatpush.msra.mxu2 %v1792_v4 }
 0x258   :  { %628 = vmatpush.msra.mxu2 %v1801_v5 }
 0x25b   :  { %1507 = vmatmul.msk.f32.gmra.mxu0 %vm62_vm1, %v54_v27 }
 0x2d0   :  { %v114_v2 = vpop.f32.mrf.mxu0 }
 0x2d1   :  { %v115_v3 = vadd.f32 %v1834_v7, %v114_v2 }
 0x2d4   :  { %v234_v40 = vpop.f32.mrf.mxu2 }
 0x2d5   :  { %v237_v41 = vadd.f32 %v234_v40, %v112_v39 }
 0x2d7   :  { %1582 = vtanh.f32 %v237_v41  ;;  %v1515_v43 = vmul.f32 -1.442695, %v237_v41 }
 0x2d8   :  { %v117_v31 = vpop.f32.mrf.mxu0 }
 0x2d9   :  { %1584 = vpow2.f32 %v1515_v43 }
 0x2dd   :  { %v1583_v42 = vpop.eup %1582 }
 0x2de   :  { %260 = vrot.lane.b32.xlu2 %v1583_v42, %s1703_s12 }
 0x2df   :  { %v1585_v44 = vpop.eup %1584 }
 0x2e0   :  { %v241_v45 = vadd.f32 1.0, %v1585_v44 }
 0x2e2   :  { %1586 = vrcp.f32 %v241_v45  ;;  %v253_v51 = vand.u32 2147483648, %v241_v45  ;;  %vm247_vm8 = vweird.f32 %v241_v45  ;;  %v251_v52 = vand.u32 2147483647, %v241_v45 }
 0x2e4   :  { %v254_v54 = vor.u32 1.1754944e-38, %v253_v51  ;;  %vm252_vm10 = vcmp.eq.f32.partialorder %v251_v52, 8.507059e+37 }
 0x2e8   :  { %v1587_v46 = vpop.eup %1586 }
 0x2e9   :  { %v243_v47 = vmul.f32 %v1587_v46, %v241_v45  ;;  %vm248_vm7 = vweird.f32 %v1587_v46 }
 0x2ea   :  { %vm249_vm9 = vmor %vm247_vm8, %vm248_vm7 }
 0x2eb   :  { %v244_v48 = vsub.f32 1.0, %v243_v47 }
 0x2ed   :  { %v245_v49 = vmul.f32 %v1587_v46, %v244_v48 }
 0x2ef   :  { %v246_v50 = vadd.f32 %v1587_v46, %v245_v49 }
 0x2f1   :  { %v250_v53 = vsel %vm249_vm9, %v1587_v46, %v246_v50 }
 0x2f2   :  { %v255_v56 = vsel %vm252_vm10, %v254_v54, %v250_v53 }
 0x2f3   :  { %v258_v58 = vmul.f32 %v255_v56, %v202_v32  ;;  %v118_v32 = vadd.f32 %v1834_v7, %v117_v31 }
 0x338   :  { %v261_v55 = vpop.permute.xlu2 %260 }
 0x339   :  { %v263_v57 = vmul.f32 %v261_v55, %v255_v56 }
 0x33b   :  { %265 = vrot.lane.b32.xlu0 %v263_v57, %s1704_s15  ;;  %v55_v57 = vld [vmem:[%s2204_s0 + $0x20] sm:$0xff] }
 0x33c   :  { %1508 = vmatmul.msk.f32.gmra.mxu0 %vm62_vm1, %v55_v57  ;;  %v57_v57 = vld [vmem:[%s2204_s0 + $0x30] sm:$0xff] }
 0x3ad   :  { %v266_v59 = vpop.permute.xlu0 %265 }
 0x3ae   :  { %v268_v60 = vadd.f32 %v266_v59, %v258_v58 }
 0x3b0   :  { %1588 = vtanh.f32 %v268_v60 }
 0x3b6   :  { %v1589_v61 = vpop.eup %1588 }
 0x3b7   :  { %271 = vrot.lane.b32.xlu1 %v1589_v61, %s1703_s12 }
 0x3b9   :  { %v120_v59 = vpop.f32.mrf.mxu0 }
 0x429   :  { %v272_v62 = vpop.permute.xlu1 %271 }
 0x42a   :  { %v274_v63 = vmul.f32 %v272_v62, %v255_v56 }
 0x42c   :  { %276 = vrot.lane.b32.xlu2 %v274_v63, %s1704_s15 }
 0x486   :  { %v277_v1 = vpop.permute.xlu2 %276 }
 0x487   :  { %279 = vst.msk [vmem:[#allocation3 + $0x8] sm:$0xff] %vm143_vm2, %v277_v1  ;;  %1516 = vmatmul.msk.f32.vlgmr.msra.gmra.mxu3 %vm143_vm2, %v277_v1 }
 0x50a   :  { %v300_v4 = vpop.f32.mrf.mxu3 }
 0x50b   :  { %v303_v5 = vadd.f32 %v300_v4, %v115_v3 }
 0x50d   :  { %1590 = vtanh.f32 %v303_v5  ;;  %v1517_v8 = vmul.f32 -1.442695, %v303_v5 }
 0x50f   :  { %1592 = vpow2.f32 %v1517_v8 }
 0x513   :  { %v1591_v6 = vpop.eup %1590 }
 0x514   :  { %326 = vrot.lane.b32.xlu0 %v1591_v6, %s1703_s12 }
 0x515   :  { %v1593_v9 = vpop.eup %1592 }
 0x516   :  { %v307_v10 = vadd.f32 1.0, %v1593_v9 }
 0x518   :  { %1594 = vrcp.f32 %v307_v10  ;;  %v319_v16 = vand.u32 2147483648, %v307_v10  ;;  %vm313_vm12 = vweird.f32 %v307_v10  ;;  %v317_v17 = vand.u32 2147483647, %v307_v10 }
 0x51a   :  { %v320_v19 = vor.u32 1.1754944e-38, %v319_v16  ;;  %vm318_vm14 = vcmp.eq.f32.partialorder %v317_v17, 8.507059e+37 }
 0x51e   :  { %v1595_v11 = vpop.eup %1594 }
 0x51f   :  { %v309_v12 = vmul.f32 %v1595_v11, %v307_v10  ;;  %vm314_vm11 = vweird.f32 %v1595_v11 }
 0x520   :  { %vm315_vm13 = vmor %vm313_vm12, %vm314_vm11 }
 0x521   :  { %v310_v13 = vsub.f32 1.0, %v309_v12 }
 0x523   :  { %v311_v14 = vmul.f32 %v1595_v11, %v310_v13 }
 0x525   :  { %v312_v15 = vadd.f32 %v1595_v11, %v311_v14 }
 0x527   :  { %v316_v18 = vsel %vm315_vm13, %v1595_v11, %v312_v15 }
 0x528   :  { %v321_v21 = vsel %vm318_vm14, %v320_v19, %v316_v18 }
 0x529   :  { %v324_v23 = vmul.f32 %v321_v21, %v268_v60  ;;  %v121_v60 = vadd.f32 %v1834_v7, %v120_v59 }
 0x586   :  { %v327_v20 = vpop.permute.xlu0 %326 }
 0x587   :  { %v329_v22 = vmul.f32 %v327_v20, %v321_v21 }
 0x589   :  { %331 = vrot.lane.b32.xlu1 %v329_v22, %s1704_s15  ;;  %v679_v22 = vld [vmem:[%s2208_s4 + $0x18] sm:$0xff] }
 0x58a   :  { %732 = vmatpush.msra.mxu3 %v679_v22 }
 0x5fb   :  { %v332_v24 = vpop.permute.xlu1 %331 }
 0x5fc   :  { %v334_v25 = vadd.f32 %v332_v24, %v324_v23  ;;  %v678_v23 = vld [vmem:[%s2208_s4 + $0x10] sm:$0xff]  ;;  %v56_v24 = vld [vmem:[%s2204_s0 + $0x28] sm:$0xff] }
 0x5fd   :  { %1509 = vmatmul.msk.f32.gmra.mxu0 %vm62_vm1, %v56_v24  ;;  %733 = vmatpush.msra.mxu3 %v678_v23 }
 0x5fe   :  { %1596 = vtanh.f32 %v334_v25 }
 0x604   :  { %v1597_v26 = vpop.eup %1596 }
 0x605   :  { %337 = vrot.lane.b32.xlu2 %v1597_v26, %s1703_s12  ;;  %v676_v26 = vld [vmem:[%s2208_s4] sm:$0xff]  ;;  %1510 = vmatmul.msk.f32.gmra.mxu0 %vm62_vm1, %v57_v57 }
 0x65f   :  { %v338_v28 = vpop.permute.xlu2 %337 }
 0x660   :  { %v340_v29 = vmul.f32 %v338_v28, %v321_v21  ;;  %v685_v28 = vld [vmem:[#allocation3] sm:$0xff] }
 0x662   :  { %342 = vrot.lane.b32.xlu0 %v340_v29, %s1704_s15  ;;  %v686_v29 = vld [vmem:[#allocation3 + $0x8] sm:$0xff] }
 0x6d4   :  { %v343_v30 = vpop.permute.xlu0 %342 }
 0x6d5   :  { %345 = vst.msk [vmem:[#allocation3 + $0x10] sm:$0xff] %vm143_vm2, %v343_v30  ;;  %1518 = vmatmul.msk.f32.vlgmr.msrb.gmra.mxu1 %vm143_vm2, %v343_v30 }
 0x6dc   :  { %v687_v30 = vld [vmem:[#allocation3 + $0x10] sm:$0xff] }
 0x752   :  { %v366_v33 = vpop.f32.mrf.mxu1 }
 0x753   :  { %v369_v34 = vadd.f32 %v366_v33, %v118_v32  ;;  %v123_v33 = vpop.f32.mrf.mxu0 }
 0x755   :  { %1598 = vtanh.f32 %v369_v34  ;;  %v1519_v36 = vmul.f32 -1.442695, %v369_v34  ;;  %v124_v34 = vadd.f32 %v1834_v7, %v123_v33 }
 0x757   :  { %1600 = vpow2.f32 %v1519_v36 }
 0x75b   :  { %v1599_v35 = vpop.eup %1598 }
 0x75c   :  { %392 = vrot.lane.b32.xlu1 %v1599_v35, %s1703_s12 }
 0x75d   :  { %v1601_v37 = vpop.eup %1600 }
 0x75e   :  { %v373_v38 = vadd.f32 1.0, %v1601_v37 }
 0x760   :  { %1602 = vrcp.f32 %v373_v38  ;;  %v385_v44 = vand.u32 2147483648, %v373_v38  ;;  %vm379_vm0 = vweird.f32 %v373_v38  ;;  %v383_v45 = vand.u32 2147483647, %v373_v38 }
 0x762   :  { %v386_v47 = vor.u32 1.1754944e-38, %v385_v44  ;;  %vm384_vm4 = vcmp.eq.f32.partialorder %v383_v45, 8.507059e+37 }
 0x766   :  { %v1603_v39 = vpop.eup %1602 }
 0x767   :  { %v375_v40 = vmul.f32 %v1603_v39, %v373_v38  ;;  %vm380_vm15 = vweird.f32 %v1603_v39 }
 0x768   :  { %vm381_vm3 = vmor %vm379_vm0, %vm380_vm15 }
 0x769   :  { %v376_v41 = vsub.f32 1.0, %v375_v40 }
 0x76b   :  { %v377_v42 = vmul.f32 %v1603_v39, %v376_v41 }
 0x76d   :  { %v378_v43 = vadd.f32 %v1603_v39, %v377_v42 }
 0x76f   :  { %v382_v46 = vsel %vm381_vm3, %v1603_v39, %v378_v43 }
 0x770   :  { %v387_v49 = vsel %vm384_vm4, %v386_v47, %v382_v46 }
 0x771   :  { %v390_v51 = vmul.f32 %v387_v49, %v334_v25  ;;  %v677_v25 = vld [vmem:[%s2208_s4 + $0x8] sm:$0xff] }
 0x772   :  { %734 = vmatpush.msra.mxu3 %v677_v25 }
 0x774   :  { %735 = vmatpush.msra.mxu3 %v676_v26 }
 0x7ce   :  { %v393_v48 = vpop.permute.xlu1 %392 }
 0x7cf   :  { %v395_v50 = vmul.f32 %v393_v48, %v387_v49 }
 0x7d1   :  { %397 = vrot.lane.b32.xlu2 %v395_v50, %s1704_s15 }
 0x82b   :  { %v398_v52 = vpop.permute.xlu2 %397 }
 0x82c   :  { %v400_v53 = vadd.f32 %v398_v52, %v390_v51 }
 0x82e   :  { %1604 = vtanh.f32 %v400_v53 }
 0x834   :  { %v1605_v54 = vpop.eup %1604 }
 0x835   :  { %403 = vrot.lane.b32.xlu0 %v1605_v54, %s1703_s12 }
 0x8a7   :  { %v404_v55 = vpop.permute.xlu0 %403 }
 0x8a8   :  { %v406_v56 = vmul.f32 %v404_v55, %v387_v49 }
 0x8aa   :  { %408 = vrot.lane.b32.xlu1 %v406_v56, %s1704_s15 }
 0x91c   :  { %v409_v58 = vpop.permute.xlu1 %408 }
 0x91d   :  { %411 = vst.msk [vmem:[#allocation3 + $0x18] sm:$0xff] %vm143_vm2, %v409_v58  ;;  %1520 = vmatmul.msk.f32.vlgmr.msrb.gmra.mxu2 %vm143_vm2, %v409_v58 }
 0x924   :  { %v688_v31 = vld [vmem:[#allocation3 + $0x18] sm:$0xff] }
 0x9a0   :  { %v432_v61 = vpop.f32.mrf.mxu2 }
 0x9a1   :  { %v435_v62 = vadd.f32 %v432_v61, %v121_v60  ;;  %v1931_v60 = vld [vmem:[%s2210_s5 + $0x18] sm:$0xff]  ;;  %v1936_v61 = vld [vmem:[%s2210_s5 + $0x10] sm:$0xff] }
 0x9a2   :  { %789 = vmatpush.msrb.mxu1 %v1931_v60  ;;  %1242 = vmatpush.msrb.mxu0 %v1931_v60 }
 0x9a3   :  { %1606 = vtanh.f32 %v435_v62  ;;  %v1521_v0 = vmul.f32 -1.442695, %v435_v62  ;;  %v1943_v62 = vld [vmem:[%s2210_s5 + $0x8] sm:$0xff] }
 0x9a4   :  { %790 = vmatpush.msrb.mxu1 %v1936_v61  ;;  %1243 = vmatpush.msrb.mxu0 %v1936_v61 }
 0x9a5   :  { %1608 = vpow2.f32 %v1521_v0  ;;  %v1537_v0 = vld [vmem:[%s2207_s8 + $0x8] sm:$0xff] }
 0x9a6   :  { %791 = vmatpush.msrb.mxu1 %v1943_v62  ;;  %1244 = vmatpush.msrb.mxu0 %v1943_v62 }
 0x9a9   :  { %v1607_v63 = vpop.eup %1606 }
 0x9aa   :  { %458 = vrot.lane.b32.xlu2 %v1607_v63, %s1703_s12  ;;  %v1950_v63 = vld [vmem:[%s2210_s5] sm:$0xff]  ;;  %s1710_s5 = smov 6  }
 0x9ab   :  { %v1609_v1 = vpop.eup %1608  ;;  %792 = vmatpush.msrb.mxu1 %v1950_v63  ;;  %1245 = vmatpush.msrb.mxu0 %v1950_v63 }
 0x9ac   :  { %v439_v2 = vadd.f32 1.0, %v1609_v1 }
 0x9ae   :  { %1610 = vrcp.f32 %v439_v2  ;;  %v451_v9 = vand.u32 2147483648, %v439_v2  ;;  %vm445_vm6 = vweird.f32 %v439_v2  ;;  %v449_v10 = vand.u32 2147483647, %v439_v2 }
 0x9b0   :  { %v452_v12 = vor.u32 1.1754944e-38, %v451_v9  ;;  %vm450_vm8 = vcmp.eq.f32.partialorder %v449_v10, 8.507059e+37 }
 0x9b4   :  { %v1611_v3 = vpop.eup %1610 }
 0x9b5   :  { %v441_v4 = vmul.f32 %v1611_v3, %v439_v2  ;;  %vm446_vm5 = vweird.f32 %v1611_v3  ;;  %v1536_v2 = vld [vmem:[%s2206_s7 + $0x8] sm:$0xff] }
 0x9b6   :  { %vm447_vm7 = vmor %vm445_vm6, %vm446_vm5 }
 0x9b7   :  { %v442_v5 = vsub.f32 1.0, %v441_v4 }
 0x9b9   :  { %v443_v6 = vmul.f32 %v1611_v3, %v442_v5  ;;  %v1980_v5 = vld [vmem:[%s2209_s6] ss:$0 sm:$0xff] }
 0x9bb   :  { %v444_v8 = vadd.f32 %v1611_v3, %v443_v6 }
 0x9bd   :  { %v448_v11 = vsel %vm447_vm7, %v1611_v3, %v444_v8 }
 0x9be   :  { %v453_v14 = vsel %vm450_vm8, %v452_v12, %v448_v11 }
 0x9bf   :  { %v456_v16 = vmul.f32 %v453_v14, %v400_v53 }
 0xa04   :  { %v459_v13 = vpop.permute.xlu2 %458 }
 0xa05   :  { %v461_v15 = vmul.f32 %v459_v13, %v453_v14 }
 0xa07   :  { %463 = vrot.lane.b32.xlu0 %v461_v15, %s1704_s15 }
 0xa79   :  { %v464_v17 = vpop.permute.xlu0 %463 }
 0xa7a   :  { %v466_v18 = vadd.f32 %v464_v17, %v456_v16 }
 0xa7c   :  { %1612 = vtanh.f32 %v466_v18 }
 0xa82   :  { %v1613_v19 = vpop.eup %1612 }
 0xa83   :  { %469 = vrot.lane.b32.xlu1 %v1613_v19, %s1703_s12 }
 0xaf5   :  { %v470_v20 = vpop.permute.xlu1 %469 }
 0xaf6   :  { %v472_v21 = vmul.f32 %v470_v20, %v453_v14 }
 0xaf8   :  { %474 = vrot.lane.b32.xlu2 %v472_v21, %s1704_s15 }
 0xb52   :  { %v475_v27 = vpop.permute.xlu2 %474 }
 0xb53   :  { %477 = vst.msk [vmem:[#allocation3 + $0x20] sm:$0xff] %vm143_vm2, %v475_v27  ;;  %1522 = vmatmul.msk.f32.vlgmr.msrb.gmra.mxu3 %vm143_vm2, %v475_v27 }
 0xb5a   :  { %v689_v32 = vld [vmem:[#allocation3 + $0x20] sm:$0xff] }
 0xb5b   :  { %1528 = vmatmul.msk.f32.vlgmr.msra.gmra.mxu3 %vm143_vm2, %v685_v28 }
 0xb63   :  { %1529 = vmatmul.msk.f32.gmra.mxu3 %vm143_vm2, %v686_v29 }
 0xb6b   :  { %1530 = vmatmul.msk.f32.gmra.mxu3 %vm143_vm2, %v687_v30 }
 0xb73   :  { %1531 = vmatmul.msk.f32.gmra.mxu3 %vm143_vm2, %v688_v31 }
 0xb7b   :  { %1532 = vmatmul.msk.f32.gmra.mxu3 %vm143_vm2, %v689_v32 }
 0xbd6   :  { %v498_v35 = vpop.f32.mrf.mxu3 }
 0xbd7   :  { %v501_v36 = vadd.f32 %v498_v35, %v124_v34 }
 0xbd9   :  { %1614 = vtanh.f32 %v501_v36  ;;  %v1523_v38 = vmul.f32 -1.442695, %v501_v36 }
 0xbdb   :  { %1616 = vpow2.f32 %v1523_v38 }
 0xbde   :  { %v737_v6 = vpop.f32.mrf.mxu3 }
 0xbdf   :  { %v1615_v37 = vpop.eup %1614  ;;  %v738_v8 = vadd.f32 %v1980_v5, %v737_v6 }
 0xbe0   :  { %524 = vrot.lane.b32.xlu0 %v1615_v37, %s1703_s12 }
 0xbe1   :  { %v1617_v39 = vpop.eup %1616 }
 0xbe2   :  { %v505_v40 = vadd.f32 1.0, %v1617_v39 }
 0xbe4   :  { %1618 = vrcp.f32 %v505_v40  ;;  %v517_v46 = vand.u32 2147483648, %v505_v40  ;;  %vm511_vm10 = vweird.f32 %v505_v40  ;;  %v515_v47 = vand.u32 2147483647, %v505_v40 }
 0xbe6   :  { %v518_v49 = vor.u32 1.1754944e-38, %v517_v46  ;;  %vm516_vm12 = vcmp.eq.f32.partialorder %v515_v47, 8.507059e+37  ;;  %v740_v35 = vpop.f32.mrf.mxu3 }
 0xbe7   :  { %v741_v36 = vadd.f32 %v1980_v5, %v740_v35 }
 0xbea   :  { %v1619_v41 = vpop.eup %1618 }
 0xbeb   :  { %v507_v42 = vmul.f32 %v1619_v41, %v505_v40  ;;  %vm512_vm9 = vweird.f32 %v1619_v41 }
 0xbec   :  { %vm513_vm11 = vmor %vm511_vm10, %vm512_vm9 }
 0xbed   :  { %v508_v43 = vsub.f32 1.0, %v507_v42 }
 0xbef   :  { %v509_v44 = vmul.f32 %v1619_v41, %v508_v43 }
 0xbf1   :  { %v510_v45 = vadd.f32 %v1619_v41, %v509_v44 }
 0xbf3   :  { %v514_v48 = vsel %vm513_vm11, %v1619_v41, %v510_v45 }
 0xbf4   :  { %v519_v51 = vsel %vm516_vm12, %v518_v49, %v514_v48 }
 0xbf5   :  { %v522_v53 = vmul.f32 %v519_v51, %v466_v18 }
 0xc52   :  { %v525_v50 = vpop.permute.xlu0 %524 }
 0xc53   :  { %v527_v52 = vmul.f32 %v525_v50, %v519_v51 }
 0xc55   :  { %529 = vrot.lane.b32.xlu1 %v527_v52, %s1704_s15 }
 0xcc7   :  { %v530_v54 = vpop.permute.xlu1 %529 }
 0xcc8   :  { %v1919_v55 = vadd.f32 %v530_v54, %v522_v53 }
 0xcca   :  { %1620 = vtanh.f32 %v1919_v55 }
 0xcd0   :  { %v1621_v56 = vpop.eup %1620 }
 0xcd1   :  { %535 = vrot.lane.b32.xlu2 %v1621_v56, %s1703_s12 }
 0xcd9   :  { %819 = vrot.lane.b32.xlu2 %v1537_v0, %s1704_s15 }
 0xd2b   :  { %v536_v58 = vpop.permute.xlu2 %535 }
 0xd2c   :  { %v538_v59 = vmul.f32 %v536_v58, %v519_v51 }
 0xd2e   :  { %540 = vrot.lane.b32.xlu0 %v538_v59, %s1704_s15 }
 0xd33   :  { %v820_v27 = vpop.permute.xlu2 %819 }
 0xda0   :  { %v541_v1 = vpop.permute.xlu0 %540 }
 0xda1   :  { %543 = vst.msk [vmem:[#allocation3 + $0x28] sm:$0xff] %vm143_vm2, %v541_v1  ;;  %1524 = vmatmul.msk.f32.vlgmr.msra.gmra.mxu1 %vm143_vm2, %v541_v1 }
 0xda2   :  { %882 = vmatpush.msra.mxu1 %v1931_v60 }
 0xda4   :  { %883 = vmatpush.msra.mxu1 %v1936_v61 }
 0xda6   :  { %884 = vmatpush.msra.mxu1 %v1943_v62 }
 0xda8   :  { %v690_v3 = vld [vmem:[#allocation3 + $0x28] sm:$0xff]  ;;  %885 = vmatpush.msra.mxu1 %v1950_v63 }
 0xda9   :  { %1533 = vmatmul.msk.f32.gmra.mxu3 %vm143_vm2, %v690_v3  ;;  %1538 = vmatmul.msk.f32.vlgmr.msrb.gmra.mxu1 %vm143_vm2, %v1536_v2  ;;  %v743_v3 = vpop.f32.mrf.mxu3 }
 0xdaa   :  { %972 = vmatpush.msrb.mxu1 %v1931_v60  ;;  %v744_v6 = vadd.f32 %v1980_v5, %v743_v3 }
 0xdac   :  { %973 = vmatpush.msrb.mxu1 %v1936_v61 }
 0xdae   :  { %974 = vmatpush.msrb.mxu1 %v1943_v62 }
 0xdb0   :  { %975 = vmatpush.msrb.mxu1 %v1950_v63 }
 0xe1e   :  { %v1975_v4 = vpop.f32.mrf.mxu1 }
 0xe26   :  { %v794_v9 = vpop.f32.mrf.mxu1 }
 0xe27   :  { %v797_v10 = vadd.f32 %v794_v9, %v738_v8 }
 0xe29   :  { %1622 = vtanh.f32 %v797_v10  ;;  %v1539_v12 = vmul.f32 -1.442695, %v797_v10 }
 0xe2b   :  { %1624 = vpow2.f32 %v1539_v12 }
 0xe2f   :  { %v1623_v11 = vpop.eup %1622 }
 0xe30   :  { %824 = vrot.lane.b32.xlu1 %v1623_v11, %s1703_s12 }
 0xe31   :  { %v1625_v13 = vpop.eup %1624 }
 0xe32   :  { %v801_v14 = vadd.f32 1.0, %v1625_v13 }
 0xe34   :  { %1626 = vrcp.f32 %v801_v14  ;;  %v813_v20 = vand.u32 2147483648, %v801_v14  ;;  %vm807_vm14 = vweird.f32 %v801_v14  ;;  %v811_v21 = vand.u32 2147483647, %v801_v14 }
 0xe36   :  { %v814_v23 = vor.u32 1.1754944e-38, %v813_v20  ;;  %vm812_vm0 = vcmp.eq.f32.partialorder %v811_v21, 8.507059e+37 }
 0xe3a   :  { %v1627_v15 = vpop.eup %1626 }
 0xe3b   :  { %v803_v16 = vmul.f32 %v1627_v15, %v801_v14  ;;  %vm808_vm13 = vweird.f32 %v1627_v15 }
 0xe3c   :  { %vm809_vm15 = vmor %vm807_vm14, %vm808_vm13 }
 0xe3d   :  { %v804_v17 = vsub.f32 1.0, %v803_v16 }
 0xe3f   :  { %v805_v18 = vmul.f32 %v1627_v15, %v804_v17 }
 0xe41   :  { %v806_v19 = vadd.f32 %v1627_v15, %v805_v18 }
 0xe43   :  { %v810_v22 = vsel %vm809_vm15, %v1627_v15, %v806_v19 }
 0xe44   :  { %v815_v24 = vsel %vm812_vm0, %v814_v23, %v810_v22 }
 0xe45   :  { %v822_v28 = vmul.f32 %v820_v27, %v815_v24 }
 0xea2   :  { %v825_v25 = vpop.permute.xlu1 %824 }
 0xea3   :  { %v827_v26 = vmul.f32 %v825_v25, %v815_v24 }
 0xea5   :  { %829 = vrot.lane.b32.xlu0 %v827_v26, %s1704_s15 }
 0xf17   :  { %v830_v29 = vpop.permute.xlu0 %829 }
 0xf18   :  { %v832_v30 = vadd.f32 %v830_v29, %v822_v28 }
 0xf1a   :  { %1628 = vtanh.f32 %v832_v30 }
 0xf20   :  { %v1629_v31 = vpop.eup %1628 }
 0xf21   :  { %835 = vrot.lane.b32.xlu1 %v1629_v31, %s1703_s12 }
 0xf93   :  { %v836_v32 = vpop.permute.xlu1 %835 }
 0xf94   :  { %v838_v33 = vmul.f32 %v836_v32, %v815_v24 }
 0xf96   :  { %843 = vrot.lane.b32.xlu2 %v838_v33, %s1704_s15  ;;  %v746_v33 = vpop.f32.mrf.mxu3 }
 0xf97   :  { %v747_v35 = vadd.f32 %v1980_v5, %v746_v33 }
 0xf9e   :  { %v749_v3 = vpop.f32.mrf.mxu3 }
 0xff0   :  { %v1987_v34 = vpop.permute.xlu2 %843 }
 0xff1   :  { %1541 = vmatmul.msk.f32.vlgmr.msra.gmra.mxu1 %vm143_vm2, %v1987_v34 }
 0xff2   :  { %1062 = vmatpush.msra.mxu1 %v1931_v60 }
 0xff4   :  { %1063 = vmatpush.msra.mxu1 %v1936_v61 }
 0xff6   :  { %1064 = vmatpush.msra.mxu1 %v1943_v62 }
 0xff8   :  { %1065 = vmatpush.msra.mxu1 %v1950_v63 }
0x106e   :  { %v887_v37 = vpop.f32.mrf.mxu1 }
0x106f   :  { %v890_v38 = vadd.f32 %v887_v37, %v741_v36 }
0x1071   :  { %1630 = vtanh.f32 %v890_v38  ;;  %v1542_v40 = vmul.f32 -1.442695, %v890_v38 }
0x1073   :  { %1632 = vpow2.f32 %v1542_v40 }
0x1077   :  { %v1631_v39 = vpop.eup %1630 }
0x1078   :  { %913 = vrot.lane.b32.xlu0 %v1631_v39, %s1703_s12 }
0x1079   :  { %v1633_v41 = vpop.eup %1632 }
0x107a   :  { %v894_v42 = vadd.f32 1.0, %v1633_v41 }
0x107c   :  { %1634 = vrcp.f32 %v894_v42  ;;  %v906_v48 = vand.u32 2147483648, %v894_v42  ;;  %vm900_vm4 = vweird.f32 %v894_v42  ;;  %v904_v49 = vand.u32 2147483647, %v894_v42 }
0x107e   :  { %v907_v51 = vor.u32 1.1754944e-38, %v906_v48  ;;  %vm905_vm6 = vcmp.eq.f32.partialorder %v904_v49, 8.507059e+37 }
0x1082   :  { %v1635_v43 = vpop.eup %1634 }
0x1083   :  { %v896_v44 = vmul.f32 %v1635_v43, %v894_v42  ;;  %vm901_vm3 = vweird.f32 %v1635_v43 }
0x1084   :  { %vm902_vm5 = vmor %vm900_vm4, %vm901_vm3 }
0x1085   :  { %v897_v45 = vsub.f32 1.0, %v896_v44 }
0x1087   :  { %v898_v46 = vmul.f32 %v1635_v43, %v897_v45 }
0x1089   :  { %v899_v47 = vadd.f32 %v1635_v43, %v898_v46 }
0x108b   :  { %v903_v50 = vsel %vm902_vm5, %v1635_v43, %v899_v47 }
0x108c   :  { %v908_v53 = vsel %vm905_vm6, %v907_v51, %v903_v50 }
0x108d   :  { %v911_v56 = vmul.f32 %v908_v53, %v832_v30 }
0x10ea   :  { %v914_v52 = vpop.permute.xlu0 %913 }
0x10eb   :  { %v916_v54 = vmul.f32 %v914_v52, %v908_v53 }
0x10ed   :  { %918 = vrot.lane.b32.xlu1 %v916_v54, %s1704_s15 }
0x115f   :  { %v919_v57 = vpop.permute.xlu1 %918 }
0x1160   :  { %v921_v58 = vadd.f32 %v919_v57, %v911_v56 }
0x1162   :  { %1636 = vtanh.f32 %v921_v58 }
0x1168   :  { %v1637_v59 = vpop.eup %1636 }
0x1169   :  { %924 = vrot.lane.b32.xlu2 %v1637_v59, %s1703_s12 }
0x11c3   :  { %v925_v0 = vpop.permute.xlu2 %924 }
0x11c4   :  { %v927_v1 = vmul.f32 %v925_v0, %v908_v53 }
0x11c6   :  { %929 = vrot.lane.b32.xlu0 %v927_v1, %s1704_s15 }
0x1238   :  { %v2000_v2 = vpop.permute.xlu0 %929 }
0x1239   :  { %1544 = vmatmul.msk.f32.vlgmr.msrb.gmra.mxu1 %vm143_vm2, %v2000_v2 }
0x123a   :  { %1152 = vmatpush.msrb.mxu1 %v1931_v60 }
0x123c   :  { %1153 = vmatpush.msrb.mxu1 %v1936_v61 }
0x123e   :  { %1154 = vmatpush.msrb.mxu1 %v1943_v62 }
0x1240   :  { %1155 = vmatpush.msrb.mxu1 %v1950_v63 }
0x12b6   :  { %v977_v8 = vpop.f32.mrf.mxu1 }
0x12b7   :  { %v980_v9 = vadd.f32 %v977_v8, %v744_v6  ;;  %v750_v6 = vadd.f32 %v1980_v5, %v749_v3 }
0x12b9   :  { %1638 = vtanh.f32 %v980_v9  ;;  %v1545_v11 = vmul.f32 -1.442695, %v980_v9 }
0x12bb   :  { %1640 = vpow2.f32 %v1545_v11 }
0x12bf   :  { %v1639_v10 = vpop.eup %1638 }
0x12c0   :  { %1003 = vrot.lane.b32.xlu1 %v1639_v10, %s1703_s12 }
0x12c1   :  { %v1641_v12 = vpop.eup %1640 }
0x12c2   :  { %v984_v13 = vadd.f32 1.0, %v1641_v12 }
0x12c4   :  { %1642 = vrcp.f32 %v984_v13  ;;  %v996_v19 = vand.u32 2147483648, %v984_v13  ;;  %vm990_vm8 = vweird.f32 %v984_v13  ;;  %v994_v20 = vand.u32 2147483647, %v984_v13 }
0x12c6   :  { %v997_v22 = vor.u32 1.1754944e-38, %v996_v19  ;;  %vm995_vm10 = vcmp.eq.f32.partialorder %v994_v20, 8.507059e+37 }
0x12ca   :  { %v1643_v14 = vpop.eup %1642 }
0x12cb   :  { %v986_v15 = vmul.f32 %v1643_v14, %v984_v13  ;;  %vm991_vm7 = vweird.f32 %v1643_v14 }
0x12cc   :  { %vm992_vm9 = vmor %vm990_vm8, %vm991_vm7 }
0x12cd   :  { %v987_v16 = vsub.f32 1.0, %v986_v15 }
0x12cf   :  { %v988_v17 = vmul.f32 %v1643_v14, %v987_v16 }
0x12d1   :  { %v989_v18 = vadd.f32 %v1643_v14, %v988_v17 }
0x12d3   :  { %v993_v21 = vsel %vm992_vm9, %v1643_v14, %v989_v18  ;;  %v126_v18 = vpop.f32.mrf.mxu0 }
0x12d4   :  { %v998_v24 = vsel %vm995_vm10, %v997_v22, %v993_v21  ;;  %v127_v22 = vadd.f32 %v1834_v7, %v126_v18  ;;  %v40_v18 = vld [vmem:[%s2211_s9] sm:$0xff] }
0x12d5   :  { %v1001_v26 = vmul.f32 %v998_v24, %v921_v58 }
0x1332   :  { %v1004_v23 = vpop.permute.xlu1 %1003 }
0x1333   :  { %v1006_v25 = vmul.f32 %v1004_v23, %v998_v24 }
0x1335   :  { %1008 = vrot.lane.b32.xlu2 %v1006_v25, %s1704_s15  ;;  %v567_v25 = vadd.f32 %v1975_v4, %v127_v22 }
0x138f   :  { %v1009_v27 = vpop.permute.xlu2 %1008 }
0x1390   :  { %v1011_v28 = vadd.f32 %v1009_v27, %v1001_v26 }
0x1392   :  { %1644 = vtanh.f32 %v1011_v28 }
0x1398   :  { %v1645_v29 = vpop.eup %1644 }
0x1399   :  { %1014 = vrot.lane.b32.xlu0 %v1645_v29, %s1703_s12 }
0x140b   :  { %v1015_v30 = vpop.permute.xlu0 %1014 }
0x140c   :  { %v1017_v31 = vmul.f32 %v1015_v30, %v998_v24  ;;  %v1525_v30 = vmul.f32 -1.442695, %v567_v25 }
0x140e   :  { %1019 = vrot.lane.b32.xlu1 %v1017_v31, %s1704_s15 }
0x1480   :  { %v2013_v32 = vpop.permute.xlu1 %1019 }
0x1481   :  { %1547 = vmatmul.msk.f32.vlgmr.msra.gmra.mxu1 %vm143_vm2, %v2013_v32 }
0x14fe   :  { %v1067_v36 = vpop.f32.mrf.mxu1 }
0x14ff   :  { %v1070_v37 = vadd.f32 %v1067_v36, %v747_v35 }
0x1501   :  { %1646 = vtanh.f32 %v1070_v37  ;;  %v1548_v39 = vmul.f32 -1.442695, %v1070_v37 }
0x1503   :  { %1648 = vpow2.f32 %v1548_v39 }
0x1507   :  { %v1647_v38 = vpop.eup %1646 }
0x1508   :  { %1093 = vrot.lane.b32.xlu2 %v1647_v38, %s1703_s12 }
0x1509   :  { %v1649_v40 = vpop.eup %1648 }
0x150a   :  { %v1074_v41 = vadd.f32 1.0, %v1649_v40 }
0x150c   :  { %1650 = vrcp.f32 %v1074_v41  ;;  %v1086_v47 = vand.u32 2147483648, %v1074_v41  ;;  %vm1080_vm12 = vweird.f32 %v1074_v41  ;;  %v1084_v48 = vand.u32 2147483647, %v1074_v41 }
0x150e   :  { %v1087_v50 = vor.u32 1.1754944e-38, %v1086_v47  ;;  %vm1085_vm14 = vcmp.eq.f32.partialorder %v1084_v48, 8.507059e+37 }
0x1512   :  { %v1651_v42 = vpop.eup %1650 }
0x1513   :  { %v1076_v43 = vmul.f32 %v1651_v42, %v1074_v41  ;;  %vm1081_vm11 = vweird.f32 %v1651_v42 }
0x1514   :  { %vm1082_vm13 = vmor %vm1080_vm12, %vm1081_vm11  ;;  %vm867_vm12 = vcmask 7168  }
0x1515   :  { %v1077_v44 = vsub.f32 1.0, %v1076_v43 }
0x1517   :  { %v1078_v45 = vmul.f32 %v1651_v42, %v1077_v44 }
0x1519   :  { %v1079_v46 = vadd.f32 %v1651_v42, %v1078_v45 }
0x151b   :  { %v1083_v49 = vsel %vm1082_vm13, %v1651_v42, %v1079_v46 }
0x151c   :  { %v1088_v52 = vsel %vm1085_vm14, %v1087_v50, %v1083_v49  ;;  %v58_v49 = vld [vmem:[%s2204_s0 + $0x38] sm:$0xff] }
0x151d   :  { %v1091_v54 = vmul.f32 %v1088_v52, %v1011_v28  ;;  %1511 = vmatmul.msk.f32.gmra.mxu0 %vm62_vm1, %v58_v49 }
0x1562   :  { %v1094_v51 = vpop.permute.xlu2 %1093 }
0x1563   :  { %v1096_v53 = vmul.f32 %v1094_v51, %v1088_v52 }
0x1565   :  { %1098 = vrot.lane.b32.xlu0 %v1096_v53, %s1704_s15 }
0x15d7   :  { %v1099_v56 = vpop.permute.xlu0 %1098 }
0x15d8   :  { %v1101_v57 = vadd.f32 %v1099_v56, %v1091_v54 }
0x15da   :  { %1652 = vtanh.f32 %v1101_v57 }
0x15e0   :  { %v1653_v58 = vpop.eup %1652 }
0x15e1   :  { %1104 = vrot.lane.b32.xlu1 %v1653_v58, %s1703_s12  ;;  %v2051_v58 = vpop.f32.mrf.mxu0 }
0x1653   :  { %v1105_v59 = vpop.permute.xlu1 %1104 }
0x1654   :  { %v1107_v0 = vmul.f32 %v1105_v59, %v1088_v52  ;;  %v752_v59 = vpop.f32.mrf.mxu3 }
0x1656   :  { %1109 = vrot.lane.b32.xlu2 %v1107_v0, %s1704_s15  ;;  %v753_v0 = vadd.f32 %v1980_v5, %v752_v59 }
0x16b0   :  { %v2022_v1 = vpop.permute.xlu2 %1109 }
0x16b1   :  { %1550 = vmatmul.msk.f32.vlgmr.msrb.gmra.mxu1 %vm143_vm2, %v2022_v1 }
0x172e   :  { %v1157_v8 = vpop.f32.mrf.mxu1 }
0x172f   :  { %v1160_v9 = vadd.f32 %v1157_v8, %v750_v6 }
0x1731   :  { %1654 = vtanh.f32 %v1160_v9  ;;  %v1551_v11 = vmul.f32 -1.442695, %v1160_v9 }
0x1733   :  { %1656 = vpow2.f32 %v1551_v11 }
0x1737   :  { %v1655_v10 = vpop.eup %1654 }
0x1738   :  { %1183 = vrot.lane.b32.xlu0 %v1655_v10, %s1703_s12 }
0x1739   :  { %v1657_v12 = vpop.eup %1656 }
0x173a   :  { %v1164_v13 = vadd.f32 1.0, %v1657_v12 }
0x173c   :  { %1658 = vrcp.f32 %v1164_v13  ;;  %v1176_v20 = vand.u32 2147483648, %v1164_v13  ;;  %vm1170_vm0 = vweird.f32 %v1164_v13  ;;  %v1174_v21 = vand.u32 2147483647, %v1164_v13 }
0x173d   :  { %1660 = vtanh.f32 %v567_v25 }
0x173e   :  { %v1177_v24 = vor.u32 1.1754944e-38, %v1176_v20  ;;  %vm1175_vm4 = vcmp.eq.f32.partialorder %v1174_v21, 8.507059e+37  ;;  %1662 = vpow2.f32 %v1525_v30 }
0x1742   :  { %v1659_v14 = vpop.eup %1658 }
0x1743   :  { %v1166_v15 = vmul.f32 %v1659_v14, %v1164_v13  ;;  %vm1171_vm15 = vweird.f32 %v1659_v14  ;;  %v1661_v29 = vpop.eup %1660  ;;  %v2059_v13 = vld [vmem:[%s2211_s9 + $0x18] sm:$0xff] }
0x1744   :  { %vm1172_vm3 = vmor %vm1170_vm0, %vm1171_vm15  ;;  %v1663_v31 = vpop.eup %1662  ;;  %859 = vmatpush.msrb.mxu2 %v2059_v13  ;;  %1305 = vmatpush.msra.mxu1 %v2059_v13 }
0x1745   :  { %v1167_v16 = vsub.f32 1.0, %v1166_v15  ;;  %v571_v33 = vadd.f32 1.0, %v1663_v31  ;;  %1395 = vmatpush.msra.mxu0 %v2059_v13 }
0x1747   :  { %v1168_v17 = vmul.f32 %v1659_v14, %v1167_v16  ;;  %1664 = vrcp.f32 %v571_v33  ;;  %v583_v42 = vand.u32 2147483648, %v571_v33  ;;  %vm577_vm6 = vweird.f32 %v571_v33  ;;  %v2071_v16 = vld [vmem:[%s2211_s9 + $0x8] sm:$0xff] }
0x1748   :  { %v581_v43 = vand.u32 2147483647, %v571_v33 }
0x1749   :  { %v1169_v19 = vadd.f32 %v1659_v14, %v1168_v17  ;;  %v584_v45 = vor.u32 1.1754944e-38, %v583_v42 }
0x174a   :  { %vm582_vm8 = vcmp.eq.f32.partialorder %v581_v43, 8.507059e+37 }
0x174b   :  { %v1173_v23 = vsel %vm1172_vm3, %v1659_v14, %v1169_v19  ;;  %v2064_v14 = vld [vmem:[%s2211_s9 + $0x10] sm:$0xff] }
0x174c   :  { %v1178_v27 = vsel %vm1175_vm4, %v1177_v24, %v1173_v23  ;;  %860 = vmatpush.msrb.mxu2 %v2064_v14  ;;  %1306 = vmatpush.msra.mxu1 %v2064_v14 }
0x174d   :  { %v1665_v7 = vpop.eup %1664  ;;  %v1181_v36 = vmul.f32 %v1178_v27, %v1101_v57  ;;  %1396 = vmatpush.msra.mxu0 %v2064_v14 }
0x174e   :  { %v573_v35 = vmul.f32 %v1665_v7, %v571_v33  ;;  %vm578_vm5 = vweird.f32 %v1665_v7  ;;  %861 = vmatpush.msrb.mxu2 %v2071_v16  ;;  %1307 = vmatpush.msra.mxu1 %v2071_v16 }
0x174f   :  { %vm579_vm7 = vmor %vm577_vm6, %vm578_vm5  ;;  %1397 = vmatpush.msra.mxu0 %v2071_v16 }
0x1750   :  { %v574_v38 = vsub.f32 1.0, %v573_v35  ;;  %862 = vmatpush.msrb.mxu2 %v40_v18  ;;  %1308 = vmatpush.msra.mxu1 %v40_v18 }
0x1751   :  { %1398 = vmatpush.msra.mxu0 %v40_v18 }
0x1752   :  { %v575_v39 = vmul.f32 %v1665_v7, %v574_v38  ;;  %1422 = vmatpush.msrb.mxu1 %v1931_v60 }
0x1754   :  { %v576_v40 = vadd.f32 %v1665_v7, %v575_v39  ;;  %1423 = vmatpush.msrb.mxu1 %v1936_v61 }
0x1756   :  { %v580_v44 = vsel %vm579_vm7, %v1665_v7, %v576_v40  ;;  %1424 = vmatpush.msrb.mxu1 %v1943_v62 }
0x1757   :  { %v585_v47 = vsel %vm582_vm8, %v584_v45, %v580_v44 }
0x1758   :  { %v588_v52 = vmul.f32 %v585_v47, %v1919_v55  ;;  %1425 = vmatpush.msrb.mxu1 %v1950_v63 }
0x17aa   :  { %v1184_v26 = vpop.permute.xlu0 %1183 }
0x17ab   :  { %v1186_v28 = vmul.f32 %v1184_v26, %v1178_v27 }
0x17ad   :  { %1188 = vrot.lane.b32.xlu1 %v1186_v28, %s1704_s15 }
0x17b5   :  { %590 = vrot.lane.b32.xlu1 %v1661_v29, %s1703_s12 }
0x181f   :  { %v1189_v37 = vpop.permute.xlu1 %1188 }
0x1820   :  { %v2032_v4 = vadd.f32 %v1189_v37, %v1181_v36 }
0x1822   :  { %1666 = vtanh.f32 %v2032_v4 }
0x1827   :  { %v591_v46 = vpop.permute.xlu1 %590 }
0x1828   :  { %v1667_v41 = vpop.eup %1666  ;;  %v593_v48 = vmul.f32 %v591_v46, %v585_v47 }
0x1829   :  { %1194 = vrot.lane.b32.xlu2 %v1667_v41, %s1703_s12 }
0x1831   :  { %595 = vrot.lane.b32.xlu2 %v593_v48, %s1704_s15 }
0x1883   :  { %v1195_v50 = vpop.permute.xlu2 %1194 }
0x1884   :  { %v1197_v51 = vmul.f32 %v1195_v50, %v1178_v27 }
0x1886   :  { %1199 = vrot.lane.b32.xlu0 %v1197_v51, %s1704_s15 }
0x188b   :  { %v596_v53 = vpop.permute.xlu2 %595 }
0x188c   :  { %v2043_v54 = vadd.f32 %v596_v53, %v588_v52 }
0x188e   :  { %1668 = vtanh.f32 %v2043_v54 }
0x1894   :  { %v1669_v56 = vpop.eup %1668 }
0x1895   :  { %601 = vrot.lane.b32.xlu1 %v1669_v56, %s1703_s12 }
0x18f8   :  { %v2047_v57 = vpop.permute.xlu0 %1199 }
0x18f9   :  { %1553 = vmatmul.msk.f32.vlgmr.msrb.gmra.mxu0 %vm143_vm2, %v2047_v57 }
0x1907   :  { %v602_v8 = vpop.permute.xlu1 %601 }
0x1908   :  { %v604_v9 = vmul.f32 %v602_v8, %v585_v47 }
0x1976   :  { %v1247_v3 = vpop.f32.mrf.mxu0 }
0x1977   :  { %v1250_v55 = vadd.f32 %v1247_v3, %v753_v0 }
0x1979   :  { %1670 = vtanh.f32 %v1250_v55  ;;  %v1554_v10 = vmul.f32 -1.442695, %v1250_v55 }
0x197b   :  { %1672 = vpow2.f32 %v1554_v10 }
0x197f   :  { %v1671_v6 = vpop.eup %1670 }
0x1980   :  { %1273 = vrot.lane.b32.xlu0 %v1671_v6, %s1703_s12 }
0x1981   :  { %v1673_v11 = vpop.eup %1672 }
0x1982   :  { %v1254_v12 = vadd.f32 1.0, %v1673_v11 }
0x1984   :  { %1674 = vrcp.f32 %v1254_v12  ;;  %v1266_v22 = vand.u32 2147483648, %v1254_v12  ;;  %vm1260_vm9 = vweird.f32 %v1254_v12  ;;  %v1264_v23 = vand.u32 2147483647, %v1254_v12 }
0x1986   :  { %v1267_v25 = vor.u32 1.1754944e-38, %v1266_v22  ;;  %vm1265_vm11 = vcmp.eq.f32.partialorder %v1264_v23, 8.507059e+37 }
0x1988   :  { %606 = vrot.lane.b32.xlu0 %v604_v9, %s1704_s15 }
0x198a   :  { %v1675_v15 = vpop.eup %1674 }
0x198b   :  { %v1256_v17 = vmul.f32 %v1675_v15, %v1254_v12  ;;  %vm1261_vm1 = vweird.f32 %v1675_v15 }
0x198c   :  { %vm1262_vm10 = vmor %vm1260_vm9, %vm1261_vm1 }
0x198d   :  { %v1257_v19 = vsub.f32 1.0, %v1256_v17 }
0x198f   :  { %v1258_v20 = vmul.f32 %v1675_v15, %v1257_v19 }
0x1991   :  { %v1259_v21 = vadd.f32 %v1675_v15, %v1258_v20 }
0x1993   :  { %v1263_v24 = vsel %vm1262_vm10, %v1675_v15, %v1259_v21  ;;  %vm957_vm10 = vcmask 15368  }
0x1994   :  { %v1268_v27 = vsel %vm1265_vm11, %v1267_v25, %v1263_v24  ;;  %vm1047_vm11 = vcmask 23568  }
0x19f2   :  { %v1274_v26 = vpop.permute.xlu0 %1273 }
0x19f3   :  { %v1276_v28 = vmul.f32 %v1274_v26, %v1268_v27 }
0x19f5   :  { %1278 = vrot.lane.b32.xlu2 %v1276_v28, %s1704_s15 }
0x19fa   :  { %v607_v29 = vpop.permute.xlu0 %606 }
0x19fb   :  { %609 = vst.msk [vmem:[#allocation3 + $0x30] sm:$0xff] %vm143_vm2, %v607_v29  ;;  %1526 = vmatmul.msk.f32.vlgmr.msra.gmra.mxu2 %vm143_vm2, %v607_v29 }
0x19fc   :  { %945 = vmatpush.msra.mxu2 %v2059_v13 }
0x19fe   :  { %946 = vmatpush.msra.mxu2 %v2064_v14 }
0x1a00   :  { %947 = vmatpush.msra.mxu2 %v2071_v16 }
0x1a02   :  { %v691_v30 = vld [vmem:[#allocation3 + $0x30] sm:$0xff]  ;;  %948 = vmatpush.msra.mxu2 %v40_v18 }
0x1a03   :  { %1534 = vmatmul.msk.f32.gmra.mxu3 %vm143_vm2, %v691_v30  ;;  %1540 = vmatmul.msk.f32.vlgmr.msrb.gmra.mxu2 %vm143_vm2, %v1987_v34  ;;  %v1271_v34 = vmul.f32 %v1268_v27, %v2032_v4 }
0x1a04   :  { %1035 = vmatpush.msrb.mxu2 %v2059_v13 }
0x1a06   :  { %1036 = vmatpush.msrb.mxu2 %v2064_v14 }
0x1a08   :  { %1037 = vmatpush.msrb.mxu2 %v2071_v16 }
0x1a0a   :  { %1038 = vmatpush.msrb.mxu2 %v40_v18 }
0x1a0b   :  { %1543 = vmatmul.msk.f32.vlgmr.msra.gmra.mxu2 %vm143_vm2, %v2000_v2 }
0x1a0c   :  { %1125 = vmatpush.msra.mxu2 %v2059_v13 }
0x1a0e   :  { %1126 = vmatpush.msra.mxu2 %v2064_v14 }
0x1a10   :  { %1127 = vmatpush.msra.mxu2 %v2071_v16 }
0x1a12   :  { %1128 = vmatpush.msra.mxu2 %v40_v18 }
0x1a13   :  { %1546 = vmatmul.msk.f32.vlgmr.msrb.gmra.mxu2 %vm143_vm2, %v2013_v32 }
0x1a14   :  { %1215 = vmatpush.msrb.mxu2 %v2059_v13 }
0x1a16   :  { %1216 = vmatpush.msrb.mxu2 %v2064_v14 }
0x1a18   :  { %1217 = vmatpush.msrb.mxu2 %v2071_v16 }
0x1a1a   :  { %1218 = vmatpush.msrb.mxu2 %v40_v18 }
0x1a1b   :  { %1549 = vmatmul.msk.f32.vlgmr.msra.gmra.mxu2 %vm143_vm2, %v2022_v1 }
0x1a1c   :  { %1332 = vmatpush.msra.mxu2 %v1931_v60 }
0x1a1e   :  { %1333 = vmatpush.msra.mxu2 %v1936_v61 }
0x1a20   :  { %1334 = vmatpush.msra.mxu2 %v1943_v62  ;;  %v16_v62 = vstv %s2212_s10 }
0x1a21   :  { %17 = vst [vmem:[#allocation4] sm:$0x1] %v16_v62 }
0x1a22   :  { %1335 = vmatpush.msra.mxu2 %v1950_v63  ;;  %v1702_v63 = vld [vmem:[%s2205_s3] ss:$0 sm:$0xff]  ;;  %s1705_s3 = smov 1  }
0x1a23   :  { %1552 = vmatmul.msk.f32.vlgmr.msrb.gmra.mxu2 %vm143_vm2, %v2047_v57  ;;  %v130_v32 = vadd.f32 %v1702_v63, %v2051_v58 }
0x1a24   :  { %1485 = vmatpush.msrb.mxu2 %v2059_v13 }
0x1a26   :  { %1486 = vmatpush.msrb.mxu2 %v2064_v14 }
0x1a28   :  { %1487 = vmatpush.msrb.mxu2 %v2071_v16  ;;  %v2132_v33 = vld [vmem:[#allocation4] ss:$0 sm:$0xff] }
0x1a2a   :  { %1488 = vmatpush.msrb.mxu2 %v40_v18 }
0x1a4f   :  { %v1279_v2 = vpop.permute.xlu2 %1278 }
0x1a50   :  { %v2121_v60 = vadd.f32 %v1279_v2, %v1271_v34 }
0x1a52   :  { %1676 = vtanh.f32 %v2121_v60 }
0x1a58   :  { %v1677_v61 = vpop.eup %1676 }
0x1a59   :  { %1284 = vrot.lane.b32.xlu1 %v1677_v61, %s1703_s12 }
0x1a7e   :  { %v630_v1 = vpop.f32.mrf.mxu2 }
0x1a7f   :  { %v633_v31 = vadd.f32 %v630_v1, %v130_v32 }
0x1a81   :  { %1678 = vtanh.f32 %v633_v31  ;;  %v1527_v4 = vmul.f32 -1.442695, %v633_v31 }
0x1a83   :  { %1680 = vpow2.f32 %v1527_v4 }
0x1a86   :  { %v864_v7 = vpop.f32.mrf.mxu2  ;;  %v755_v0 = vpop.f32.mrf.mxu3 }
0x1a87   :  { %v1679_v35 = vpop.eup %1678  ;;  %v865_v36 = vadd.f32 %v2132_v33, %v864_v7  ;;  %v756_v3 = vadd.f32 %v1980_v5, %v755_v0 }
0x1a88   :  { %656 = vrot.lane.b32.xlu0 %v1679_v35, %s1703_s12 }
0x1a89   :  { %868 = vst.msk [vmem:[%s2213_s11] sm:$0xff] %vm867_vm12, %v865_v36  ;;  %v1681_v39 = vpop.eup %1680  ;;  %vm1137_vm12 = vcmask 31768  }
0x1a8a   :  { %v637_v40 = vadd.f32 1.0, %v1681_v39 }
0x1a8c   :  { %1682 = vrcp.f32 %v637_v40  ;;  %v649_v46 = vand.u32 2147483648, %v637_v40  ;;  %vm643_vm14 = vweird.f32 %v637_v40  ;;  %v647_v47 = vand.u32 2147483647, %v637_v40 }
0x1a8e   :  { %v650_v49 = vor.u32 1.1754944e-38, %v649_v46  ;;  %vm648_vm0 = vcmp.eq.f32.partialorder %v647_v47, 8.507059e+37  ;;  %v2143_v56 = vpop.f32.mrf.mxu2 }
0x1a92   :  { %v1683_v41 = vpop.eup %1682 }
0x1a93   :  { %v639_v42 = vmul.f32 %v1683_v41, %v637_v40  ;;  %vm644_vm13 = vweird.f32 %v1683_v41 }
0x1a94   :  { %vm645_vm15 = vmor %vm643_vm14, %vm644_vm13  ;;  %vm1227_vm13 = vcmask 39968   ;;  %vm1317_vm14 = vcmask 48168  }
0x1a95   :  { %v640_v43 = vsub.f32 1.0, %v639_v42 }
0x1a96   :  { %v2145_v57 = vpop.f32.mrf.mxu2 }
0x1a97   :  { %v641_v44 = vmul.f32 %v1683_v41, %v640_v43 }
0x1a99   :  { %v642_v45 = vadd.f32 %v1683_v41, %v641_v44 }
0x1a9b   :  { %v646_v48 = vsel %vm645_vm15, %v1683_v41, %v642_v45  ;;  %vm1407_vm15 = vcmask 56368  }
0x1a9c   :  { %v651_v51 = vsel %vm648_vm0, %v650_v49, %v646_v48 }
0x1a9d   :  { %v654_v9 = vmul.f32 %v651_v51, %v2043_v54 }
0x1a9e   :  { %v2147_v58 = vpop.f32.mrf.mxu2 }
0x1aa6   :  { %v2149_v59 = vpop.f32.mrf.mxu2 }
0x1acb   :  { %v1285_v37 = vpop.permute.xlu1 %1284 }
0x1acc   :  { %v1287_v38 = vmul.f32 %v1285_v37, %v1268_v27 }
0x1ace   :  { %1289 = vrot.lane.b32.xlu2 %v1287_v38, %s1704_s15 }
0x1afa   :  { %v657_v50 = vpop.permute.xlu0 %656 }
0x1afb   :  { %v659_v52 = vmul.f32 %v657_v50, %v651_v51 }
0x1afd   :  { %661 = vrot.lane.b32.xlu2 %v659_v52, %s1704_s15  ;;  %v1221_v52 = vadd.f32 %v2132_v33, %v2149_v59 }
0x1b28   :  { %v1290_v53 = vpop.permute.xlu2 %1289 }
0x1b29   :  { %1555 = vmatmul.msk.f32.vlgmr.msra.gmra.mxu1 %vm143_vm2, %v1290_v53  ;;  %1556 = vmatmul.msk.f32.vlgmr.msra.gmra.mxu2 %vm143_vm2, %v1290_v53 }
0x1b57   :  { %v662_v8 = vpop.permute.xlu2 %661 }
0x1b58   :  { %v664_v10 = vadd.f32 %v662_v8, %v654_v9 }
0x1bac   :  { %v1337_v55 = vpop.f32.mrf.mxu2 }
0x1bad   :  { %v1340_v6 = vadd.f32 %v1337_v55, %v756_v3 }
0x1baf   :  { %1684 = vtanh.f32 %v1340_v6  ;;  %v1557_v13 = vmul.f32 -1.442695, %v1340_v6 }
0x1bb0   :  { %1686 = vtanh.f32 %v664_v10 }
0x1bb1   :  { %1688 = vpow2.f32 %v1557_v13 }
0x1bb5   :  { %v1685_v11 = vpop.eup %1684 }
0x1bb6   :  { %1363 = vrot.lane.b32.xlu1 %v1685_v11, %s1703_s12  ;;  %v1687_v12 = vpop.eup %1686  ;;  %v1131_v11 = vadd.f32 %v2132_v33, %v2147_v58 }
0x1bb7   :  { %v1689_v14 = vpop.eup %1688 }
0x1bb8   :  { %v1344_v15 = vadd.f32 1.0, %v1689_v14 }
0x1bba   :  { %1690 = vrcp.f32 %v1344_v15  ;;  %v1356_v54 = vand.u32 2147483648, %v1344_v15  ;;  %vm1350_vm4 = vweird.f32 %v1344_v15  ;;  %v1354_v21 = vand.u32 2147483647, %v1344_v15 }
0x1bbc   :  { %v1357_v23 = vor.u32 1.1754944e-38, %v1356_v54  ;;  %vm1355_vm6 = vcmp.eq.f32.partialorder %v1354_v21, 8.507059e+37 }
0x1bbe   :  { %667 = vrot.lane.b32.xlu1 %v1687_v12, %s1703_s12 }
0x1bc0   :  { %v1691_v16 = vpop.eup %1690 }
0x1bc1   :  { %v1346_v17 = vmul.f32 %v1691_v16, %v1344_v15  ;;  %vm1351_vm3 = vweird.f32 %v1691_v16 }
0x1bc2   :  { %vm1352_vm5 = vmor %vm1350_vm4, %vm1351_vm3 }
0x1bc3   :  { %v1347_v18 = vsub.f32 1.0, %v1346_v17 }
0x1bc5   :  { %v1348_v19 = vmul.f32 %v1691_v16, %v1347_v18 }
0x1bc7   :  { %v1349_v20 = vadd.f32 %v1691_v16, %v1348_v19 }
0x1bc9   :  { %v1353_v22 = vsel %vm1352_vm5, %v1691_v16, %v1349_v20 }
0x1bca   :  { %v1358_v25 = vsel %vm1355_vm6, %v1357_v23, %v1353_v22 }
0x1bcb   :  { %v1361_v29 = vmul.f32 %v1358_v25, %v2121_v60  ;;  %v1310_v60 = vpop.f32.mrf.mxu1 }
0x1bcc   :  { %v1311_v59 = vadd.f32 %v2132_v33, %v1310_v60 }
0x1c28   :  { %v1364_v24 = vpop.permute.xlu1 %1363 }
0x1c29   :  { %v1366_v26 = vmul.f32 %v1364_v24, %v1358_v25 }
0x1c2b   :  { %1368 = vrot.lane.b32.xlu0 %v1366_v26, %s1704_s15 }
0x1c30   :  { %v668_v27 = vpop.permute.xlu1 %667 }
0x1c31   :  { %v670_v28 = vmul.f32 %v668_v27, %v651_v51  ;;  %v951_v51 = vadd.f32 %v2132_v33, %v2143_v56  ;;  %v1041_v56 = vadd.f32 %v2132_v33, %v2145_v57 }
0x1c33   :  { %672 = vrot.lane.b32.xlu0 %v670_v28, %s1704_s15 }
0x1c9d   :  { %v1369_v30 = vpop.permute.xlu0 %1368 }
0x1c9e   :  { %v1371_v34 = vadd.f32 %v1369_v30, %v1361_v29 }
0x1ca0   :  { %1692 = vtanh.f32 %v1371_v34 }
0x1ca5   :  { %v673_v2 = vpop.permute.xlu0 %672 }
0x1ca6   :  { %v1693_v61 = vpop.eup %1692  ;;  %675 = vst.msk [vmem:[#allocation3 + $0x38] sm:$0xff] %vm143_vm2, %v673_v2 }
0x1ca7   :  { %1374 = vrot.lane.b32.xlu2 %v1693_v61, %s1703_s12 }
0x1cad   :  { %v692_v62 = vld [vmem:[#allocation3 + $0x38] sm:$0xff] }
0x1cae   :  { %1535 = vmatmul.msk.f32.gmra.mxu3 %vm143_vm2, %v692_v62 }
0x1d01   :  { %v1375_v63 = vpop.permute.xlu2 %1374 }
0x1d02   :  { %v1377_v32 = vmul.f32 %v1375_v63, %v1358_v25 }
0x1d04   :  { %1379 = vrot.lane.b32.xlu1 %v1377_v32, %s1704_s15 }
0x1d31   :  { %v758_v31 = vpop.f32.mrf.mxu3 }
0x1d32   :  { %v759_v7 = vadd.f32 %v1980_v5, %v758_v31 }
0x1d76   :  { %v1380_v1 = vpop.permute.xlu1 %1379 }
0x1d77   :  { %1558 = vmatmul.msk.f32.vlgmr.msra.gmra.mxu0 %vm143_vm2, %v1380_v1  ;;  %1559 = vmatmul.msk.f32.vlgmr.msrb.gmra.mxu1 %vm143_vm2, %v1380_v1 }
0x1df4   :  { %v1427_v35 = vpop.f32.mrf.mxu1  ;;  %v1400_v57 = vpop.f32.mrf.mxu0 }
0x1df5   :  { %v1430_v36 = vadd.f32 %v1427_v35, %v759_v7  ;;  %v1401_v12 = vadd.f32 %v2132_v33, %v1400_v57 }
0x1df7   :  { %1694 = vtanh.f32 %v1430_v36  ;;  %v1560_v38 = vmul.f32 -1.442695, %v1430_v36 }
0x1df9   :  { %1696 = vpow2.f32 %v1560_v38 }
0x1dfd   :  { %v1695_v37 = vpop.eup %1694 }
0x1dfe   :  { %1453 = vrot.lane.b32.xlu2 %v1695_v37, %s1703_s12 }
0x1dff   :  { %v1697_v4 = vpop.eup %1696 }
0x1e00   :  { %v1434_v39 = vadd.f32 1.0, %v1697_v4 }
0x1e02   :  { %1698 = vrcp.f32 %v1434_v39  ;;  %v1446_v45 = vand.u32 2147483648, %v1434_v39  ;;  %vm1440_vm8 = vweird.f32 %v1434_v39  ;;  %v1444_v5 = vand.u32 2147483647, %v1434_v39 }
0x1e04   :  { %v1447_v47 = vor.u32 1.1754944e-38, %v1446_v45  ;;  %vm1445_vm9 = vcmp.eq.f32.partialorder %v1444_v5, 8.507059e+37 }
0x1e08   :  { %v1699_v40 = vpop.eup %1698 }
0x1e09   :  { %v1436_v41 = vmul.f32 %v1699_v40, %v1434_v39  ;;  %vm1441_vm7 = vweird.f32 %v1699_v40 }
0x1e0a   :  { %vm1442_vm1 = vmor %vm1440_vm8, %vm1441_vm7 }
0x1e0b   :  { %v1437_v42 = vsub.f32 1.0, %v1436_v41 }
0x1e0d   :  { %v1438_v43 = vmul.f32 %v1699_v40, %v1437_v42 }
0x1e0f   :  { %v1439_v44 = vadd.f32 %v1699_v40, %v1438_v43 }
0x1e11   :  { %v1443_v46 = vsel %vm1442_vm1, %v1699_v40, %v1439_v44 }
0x1e12   :  { %v1448_v49 = vsel %vm1445_vm9, %v1447_v47, %v1443_v46 }
0x1e13   :  { %v1451_v53 = vmul.f32 %v1448_v49, %v1371_v34 }
0x1e58   :  { %v1454_v48 = vpop.permute.xlu2 %1453 }
0x1e59   :  { %v1456_v50 = vmul.f32 %v1454_v48, %v1448_v49 }
0x1e5b   :  { %1458 = vrot.lane.b32.xlu0 %v1456_v50, %s1704_s15 }
0x1e63   :  { %954 = vrot.lane.b32.xlu0 %v951_v51, %s1705_s3 }
0x1e6b   :  { %1224 = vrot.lane.b32.xlu0 %v1221_v52, %s1706_s19 }
0x1ecd   :  { %v1459_v0 = vpop.permute.xlu0 %1458 }
0x1ece   :  { %v1461_v3 = vadd.f32 %v1459_v0, %v1451_v53 }
0x1ed0   :  { %1700 = vtanh.f32 %v1461_v3 }
0x1ed5   :  { %v955_v55 = vpop.permute.xlu0 %954 }
0x1ed6   :  { %v1701_v6 = vpop.eup %1700  ;;  %958 = vst.msk [vmem:[%s2213_s11] sm:$0xff] %vm957_vm10, %v955_v55 }
0x1ed7   :  { %1464 = vrot.lane.b32.xlu1 %v1701_v6, %s1703_s12 }
0x1edd   :  { %v1225_v15 = vpop.permute.xlu0 %1224 }
0x1edf   :  { %1044 = vrot.lane.b32.xlu1 %v1041_v56, %s1707_s22 }
0x1ee7   :  { %1314 = vrot.lane.b32.xlu1 %v1311_v59, %s1708_s23 }
0x1f49   :  { %v1465_v8 = vpop.permute.xlu1 %1464 }
0x1f4a   :  { %v1467_v9 = vmul.f32 %v1465_v8, %v1448_v49 }
0x1f4c   :  { %1469 = vrot.lane.b32.xlu2 %v1467_v9, %s1704_s15 }
0x1f51   :  { %v1045_v10 = vpop.permute.xlu1 %1044 }
0x1f52   :  { %1048 = vst.msk [vmem:[%s2213_s11] sm:$0xff] %vm1047_vm11, %v1045_v10 }
0x1f54   :  { %1134 = vrot.lane.b32.xlu2 %v1131_v11, %s1709_s25 }
0x1f59   :  { %v1315_v58 = vpop.permute.xlu1 %1314 }
0x1f5c   :  { %1404 = vrot.lane.b32.xlu2 %v1401_v12, %s1710_s5 }
0x1fa6   :  { %v1470_v13 = vpop.permute.xlu2 %1469 }
0x1fa7   :  { %1561 = vmatmul.msk.f32.vlgmr.msrb.gmra.mxu2 %vm143_vm2, %v1470_v13  ;;  %vm1497_vm2 = vcmask 64568  }
0x1fae   :  { %v1135_v14 = vpop.permute.xlu2 %1134 }
0x1faf   :  { %1138 = vst.msk [vmem:[%s2213_s11] sm:$0xff] %vm1137_vm12, %v1135_v14 }
0x1fb0   :  { %1228 = vst.msk [vmem:[%s2213_s11] sm:$0xff] %vm1227_vm13, %v1225_v15 }
0x1fb1   :  { %1318 = vst.msk [vmem:[%s2213_s11] sm:$0xff] %vm1317_vm14, %v1315_v58 }
0x1fb6   :  { %v1405_v16 = vpop.permute.xlu2 %1404 }
0x1fb7   :  { %1408 = vst.msk [vmem:[%s2213_s11] sm:$0xff] %vm1407_vm15, %v1405_v16 }
0x202a   :  { %v1490_v17 = vpop.f32.mrf.mxu2 }
0x202b   :  { %v1491_v18 = vadd.f32 %v2132_v33, %v1490_v17 }
0x202d   :  { %1494 = vrot.lane.b32.xlu0 %v1491_v18, %s1711_s28 }
0x209f   :  { %v1495_v19 = vpop.permute.xlu0 %1494 }
0x20a0   :  { %1498 = vst.msk [vmem:[%s2213_s11] sm:$0xff] %vm1497_vm2, %v1495_v19 }

</bundles_post_ra>
